<compile_context>
chip_gen: v7x
topology: tpu7x:2x2x1
jax: 0.10.0
libtpu: 0.0.40
codegen_flags: <defaults>
</compile_context>

<pallas_src>
import functools

import jax
import jax.numpy as jnp
from jax.experimental import pallas as pl
from jax.experimental.pallas import tpu as pltpu


# ---------------------------------------------------------------------------
# Fused kernel: maxpool(2) -> conv3x3(pad=1)+ReLU -> conv3x3(pad=1)+ReLU
# ---------------------------------------------------------------------------
def _down_kernel(x_ref, w1_ref, b1_ref, w2_ref, b2_ref, o_ref, xp1, xp2,
                 *, Ho, Wo, Cin, Cmid, Cout):
    # x_ref : (1, Ho, 2, Wo, 2*Cin)   input, pool pairs pre-relabel'd (free)
    # w1_ref: (9*Cin,  Cmid) bf16     rows ordered (dy, dx, ci)
    # b1_ref: (1, Cmid) f32
    # w2_ref: (9*Cmid, Cout) bf16
    # b2_ref: (1, Cout) f32
    # o_ref : (1, Ho*(Wo+2), Cout)    flat rows incl. 2 wrap cols per image row
    # xp1   : VMEM ((Ho+2)*(Wo+2)+2, Cin)  bf16  zero-ring-padded pooled act.
    # xp2   : VMEM ((Ho+2)*(Wo+2)+2, Cmid) bf16  zero-ring-padded conv1 act.
    SP = Wo + 2            # padded row stride of the flat scratch
    L = Ho * SP            # rows per tap slab (incl. wrap rows)
    f32 = jnp.float32

    # ---- 2x2 max pool: pure VPU, no strided / sublane gathers --------------
    x = x_ref[...]                                     # (1, Ho, 2, Wo, 2*Cin)
    v = jnp.maximum(x[0, :, 0], x[0, :, 1])            # row-pair max
    pooled = jnp.maximum(v[..., :Cin], v[..., Cin:])   # col-pair max -> (Ho,Wo,Cin)

    # ---- fill flat padded conv1 input (every cell rewritten each step) -----
    zpair = jnp.zeros((2, Cin), xp1.dtype)             # right pad y / left pad y+1
    xp1[pl.ds(0, SP + 1), :] = jnp.zeros((SP + 1, Cin), xp1.dtype)
    for y in range(Ho):                                # TODO(synk): bounded by row tiling at scale
        base = (y + 1) * SP + 1
        xp1[pl.ds(base, Wo), :] = pooled[y].astype(xp1.dtype)
        xp1[pl.ds(base + Wo, 2), :] = zpair
    xp1[pl.ds((Ho + 1) * SP + 1, SP + 1), :] = jnp.zeros((SP + 1, Cin), xp1.dtype)

    # rows whose flat position lands on a wrap column (x >= Wo) are garbage
    keep = (jax.lax.broadcasted_iota(jnp.int32, (L, 1), 0) % SP) < Wo

    # ---- conv1: 3 MXU calls, one stencil row's taps folded into K ----------
    acc1 = jnp.zeros((L, Cmid), f32)
    for dy in range(3):
        patch = jnp.concatenate(                       # (L, 3*Cin) bf16, views + lane concat
            [xp1[pl.ds(dy * SP + dx, L), :] for dx in range(3)], axis=-1)
        acc1 = acc1 + jnp.dot(patch, w1_ref[pl.ds(dy * 3 * Cin, 3 * Cin), :],
                              preferred_element_type=f32)
    h1 = jnp.maximum(acc1 + b1_ref[...], 0.0)
    h1 = jnp.where(keep, h1, 0.0)      # wrap rows -> zeros (they land on xp2's pad ring)

    # ---- fill conv2 input: one contiguous slab store + 2 tiny ring stores --
    xp2[pl.ds(0, SP + 1), :] = jnp.zeros((SP + 1, Cmid), xp2.dtype)
    xp2[pl.ds(SP + 1, L), :] = h1.astype(xp2.dtype)
    xp2[pl.ds((Ho + 1) * SP + 1, SP + 1), :] = jnp.zeros((SP + 1, Cmid), xp2.dtype)

    # ---- conv2 --------------------------------------------------------------
    acc2 = jnp.zeros((L, Cout), f32)
    for dy in range(3):
        patch = jnp.concatenate(
            [xp2[pl.ds(dy * SP + dx, L), :] for dx in range(3)], axis=-1)
        acc2 = acc2 + jnp.dot(patch, w2_ref[pl.ds(dy * 3 * Cmid, 3 * Cmid), :],
                              preferred_element_type=f32)
    h2 = jnp.where(keep, jnp.maximum(acc2 + b2_ref[...], 0.0), 0.0)

    # flat (Ho*SP, Cout) slab; the 2 wrap columns per row are dropped in the wrapper
    o_ref[...] = h2[None].astype(o_ref.dtype)


def down_fused(x_nhwc, w1_hwio, b1, w2_hwio, b2):
    N, H, W, Cin = x_nhwc.shape
    assert H % 2 == 0 and W % 2 == 0, "Down expects even spatial dims"
    Cmid = w1_hwio.shape[-1]
    Cout = w2_hwio.shape[-1]
    Ho, Wo = H // 2, W // 2
    SP = Wo + 2
    np_alloc = (Ho + 2) * SP + 2       # +2 rows: tail over-read of the (2,2) tap slab

    # Free, contiguous relabels (no data movement) + bf16 weights.
    x5 = x_nhwc.reshape(N, Ho, 2, Wo, 2 * Cin)
    w1f = w1_hwio.reshape(9 * Cin, Cmid).astype(jnp.bfloat16)   # row = dy*3*Cin + dx*Cin + ci
    w2f = w2_hwio.reshape(9 * Cmid, Cout).astype(jnp.bfloat16)
    b1f = b1.reshape(1, Cmid).astype(jnp.float32)
    b2f = b2.reshape(1, Cout).astype(jnp.float32)

    kernel = functools.partial(_down_kernel, Ho=Ho, Wo=Wo, Cin=Cin,
                               Cmid=Cmid, Cout=Cout)
    out_raw = pl.pallas_call(
        kernel,
        out_shape=jax.ShapeDtypeStruct((N, Ho * SP, Cout), x_nhwc.dtype),
        grid=(N,),
        in_specs=[
            pl.BlockSpec((1, Ho, 2, Wo, 2 * Cin), lambda n: (n, 0, 0, 0, 0)),
            pl.BlockSpec((9 * Cin, Cmid), lambda n: (0, 0)),
            pl.BlockSpec((1, Cmid), lambda n: (0, 0)),
            pl.BlockSpec((9 * Cmid, Cout), lambda n: (0, 0)),
            pl.BlockSpec((1, Cout), lambda n: (0, 0)),
        ],
        out_specs=pl.BlockSpec((1, Ho * SP, Cout), lambda n: (n, 0, 0)),
        scratch_shapes=[
            pltpu.VMEM((np_alloc, Cin), jnp.bfloat16),
            pltpu.VMEM((np_alloc, Cmid), jnp.bfloat16),
        ],
        compiler_params=pltpu.CompilerParams(
            dimension_semantics=("parallel",)),
    )(x5, w1f, b1f, w2f, b2f)

    # Drop the 2 wrap columns each padded row carries (fuses into the NCHW
    # transpose that follows in the caller).
    return out_raw.reshape(N, Ho, SP, Cout)[:, :, :Wo, :]


# ---------------------------------------------------------------------------
# Down module wrapper + params
# ---------------------------------------------------------------------------
def init_down_params(key, in_channels, out_channels):
    k1, k2, k3, k4 = jax.random.split(key, 4)
    s1 = 1.0 / jnp.sqrt(float(in_channels * 9))
    s2 = 1.0 / jnp.sqrt(float(out_channels * 9))
    return {
        "w1": jax.random.uniform(k1, (3, 3, in_channels, out_channels),
                                 jnp.float32, -s1, s1),
        "b1": jax.random.uniform(k2, (out_channels,), jnp.float32, -s1, s1),
        "w2": jax.random.uniform(k3, (3, 3, out_channels, out_channels),
                                 jnp.float32, -s2, s2),
        "b2": jax.random.uniform(k4, (out_channels,), jnp.float32, -s2, s2),
    }


@jax.jit
def down_forward(x_nchw, params):
    x = jnp.transpose(x_nchw, (0, 2, 3, 1))        # NCHW -> NHWC (glue)
    y = down_fused(x, params["w1"], params["b1"], params["w2"], params["b2"])
    return jnp.transpose(y, (0, 3, 1, 2))          # NHWC -> NCHW (glue)


# Pure-JAX reference (mirrors the PyTorch module) used only for verification.
@jax.jit
def down_reference(x_nchw, params):
    x = jnp.transpose(x_nchw, (0, 2, 3, 1))
    x = jax.lax.reduce_window(x, -jnp.inf, jax.lax.max,
                              (1, 2, 2, 1), (1, 2, 2, 1), "VALID")
    dn1 = jax.lax.conv_dimension_numbers(x.shape, params["w1"].shape,
                                         ("NHWC", "HWIO", "NHWC"))
    x = jax.lax.conv_general_dilated(x, params["w1"], (1, 1), "SAME",
                                     dimension_numbers=dn1)
    x = jax.nn.relu(x + params["b1"])
    dn2 = jax.lax.conv_dimension_numbers(x.shape, params["w2"].shape,
                                         ("NHWC", "HWIO", "NHWC"))
    x = jax.lax.conv_general_dilated(x, params["w2"], (1, 1), "SAME",
                                     dimension_numbers=dn2)
    x = jax.nn.relu(x + params["b2"])
    return jnp.transpose(x, (0, 3, 1, 2))


if __name__ == "__main__":
    key = jax.random.PRNGKey(0)
    kx, kp = jax.random.split(key)

    N, Cin, H, W = 2, 4, 16, 16          # input follows PyTorch NCHW convention
    Cout = 8
    x = jax.random.normal(kx, (N, Cin, H, W), dtype=jnp.float32)
    params = init_down_params(kp, Cin, Cout)

    out = jax.block_until_ready(down_forward(x, params))
    ref = jax.block_until_ready(down_reference(x, params))

    assert out.shape == (N, Cout, H // 2, W // 2), out.shape
    # bf16 matmul operands (f32 accumulation) vs. an all-f32 reference.
    assert jnp.allclose(out, ref, atol=5e-2, rtol=5e-2), \
        float(jnp.max(jnp.abs(out - ref)))

    print("KERNEL_OK")
</pallas_src>

<mosaic_0001>
module attributes {stable_mosaic.version = 11 : i64} {
  func.func @_down_kernel(%arg0: i32, %arg1: memref<1x8x2x8x8xf32, #tpu.memory_space<vmem>>, %arg2: memref<36x8xbf16, #tpu.memory_space<vmem>>, %arg3: memref<1x8xf32, #tpu.memory_space<vmem>>, %arg4: memref<72x8xbf16, #tpu.memory_space<vmem>>, %arg5: memref<1x8xf32, #tpu.memory_space<vmem>>, %arg6: memref<1x80x8xf32, #tpu.memory_space<vmem>>, %arg7: memref<102x4xbf16, #tpu.memory_space<vmem>>, %arg8: memref<102x8xbf16, #tpu.memory_space<vmem>>) attributes {dimension_semantics = [#tpu.dimension_semantics<parallel>], iteration_bounds = array<i64: 2>, scalar_prefetch = 0 : i64, scratch_operands = 2 : i64, tpu.core_type = #tpu.core_type<tc>, window_params = [{transform_indices = @transform_0, window_bounds = array<i64: 1, 8, 2, 8, 8>}, {pipeline_mode = #tpu.pipeline_mode<synchronous>, transform_indices = @transform_1, window_bounds = array<i64: 36, 8>}, {pipeline_mode = #tpu.pipeline_mode<synchronous>, transform_indices = @transform_2, window_bounds = array<i64: 1, 8>}, {pipeline_mode = #tpu.pipeline_mode<synchronous>, transform_indices = @transform_3, window_bounds = array<i64: 72, 8>}, {pipeline_mode = #tpu.pipeline_mode<synchronous>, transform_indices = @transform_4, window_bounds = array<i64: 1, 8>}, {transform_indices = @transform_5, window_bounds = array<i64: 1, 80, 8>}]} {
    %c0 = arith.constant 0 : index
    %c0_0 = arith.constant 0 : index
    %c0_1 = arith.constant 0 : index
    %c0_2 = arith.constant 0 : index
    %c0_3 = arith.constant 0 : index
    %0 = vector.load %arg1[%c0, %c0_0, %c0_1, %c0_2, %c0_3] : memref<1x8x2x8x8xf32, #tpu.memory_space<vmem>>, vector<1x8x2x8x8xf32>
    %1 = vector.extract_strided_slice %0 {offsets = [0, 0, 0, 0, 0], sizes = [1, 8, 1, 8, 8], strides = [1, 1, 1, 1, 1]} : vector<1x8x2x8x8xf32> to vector<1x8x1x8x8xf32>
    %2 = vector.shape_cast %1 : vector<1x8x1x8x8xf32> to vector<8x8x8xf32>
    %3 = vector.extract_strided_slice %0 {offsets = [0, 0, 1, 0, 0], sizes = [1, 8, 1, 8, 8], strides = [1, 1, 1, 1, 1]} : vector<1x8x2x8x8xf32> to vector<1x8x1x8x8xf32>
    %4 = vector.shape_cast %3 : vector<1x8x1x8x8xf32> to vector<8x8x8xf32>
    %5 = arith.maximumf %2, %4 : vector<8x8x8xf32>
    %6 = vector.extract_strided_slice %5 {offsets = [0, 0, 0], sizes = [8, 8, 4], strides = [1, 1, 1]} : vector<8x8x8xf32> to vector<8x8x4xf32>
    %7 = vector.extract_strided_slice %5 {offsets = [0, 0, 4], sizes = [8, 8, 4], strides = [1, 1, 1]} : vector<8x8x8xf32> to vector<8x8x4xf32>
    %8 = arith.maximumf %6, %7 : vector<8x8x4xf32>
    %cst = arith.constant 0.000000e+00 : bf16
    %9 = vector.broadcast %cst : bf16 to vector<2x4xbf16>
    %cst_4 = arith.constant 0.000000e+00 : bf16
    %10 = vector.broadcast %cst_4 : bf16 to vector<11x4xbf16>
    %c0_5 = arith.constant 0 : index
    %c0_6 = arith.constant 0 : index
    %11 = vector.load %arg7[%c0_5, %c0_6] : memref<102x4xbf16, #tpu.memory_space<vmem>>, vector<11x4xbf16>
    tpu.vector_store %arg7[%c0_5, %c0_6], %10 {strides = array<i32>} : memref<102x4xbf16, #tpu.memory_space<vmem>>, vector<11x4xbf16>,
    %12 = vector.extract_strided_slice %8 {offsets = [0, 0, 0], sizes = [1, 8, 4], strides = [1, 1, 1]} : vector<8x8x4xf32> to vector<1x8x4xf32>
    %13 = vector.shape_cast %12 : vector<1x8x4xf32> to vector<8x4xf32>
    %14 = arith.truncf %13 : vector<8x4xf32> to vector<8x4xbf16>
    %c11 = arith.constant 11 : index
    %c0_7 = arith.constant 0 : index
    %15 = vector.load %arg7[%c11, %c0_7] : memref<102x4xbf16, #tpu.memory_space<vmem>>, vector<8x4xbf16>
    tpu.vector_store %arg7[%c11, %c0_7], %14 {strides = array<i32>} : memref<102x4xbf16, #tpu.memory_space<vmem>>, vector<8x4xbf16>,
    %c19 = arith.constant 19 : index
    %c0_8 = arith.constant 0 : index
    %16 = vector.load %arg7[%c19, %c0_8] : memref<102x4xbf16, #tpu.memory_space<vmem>>, vector<2x4xbf16>
    tpu.vector_store %arg7[%c19, %c0_8], %9 {strides = array<i32>} : memref<102x4xbf16, #tpu.memory_space<vmem>>, vector<2x4xbf16>,
    %17 = vector.extract_strided_slice %8 {offsets = [1, 0, 0], sizes = [1, 8, 4], strides = [1, 1, 1]} : vector<8x8x4xf32> to vector<1x8x4xf32>
    %18 = vector.shape_cast %17 : vector<1x8x4xf32> to vector<8x4xf32>
    %19 = arith.truncf %18 : vector<8x4xf32> to vector<8x4xbf16>
    %c21 = arith.constant 21 : index
    %c0_9 = arith.constant 0 : index
    %20 = vector.load %arg7[%c21, %c0_9] : memref<102x4xbf16, #tpu.memory_space<vmem>>, vector<8x4xbf16>
    tpu.vector_store %arg7[%c21, %c0_9], %19 {strides = array<i32>} : memref<102x4xbf16, #tpu.memory_space<vmem>>, vector<8x4xbf16>,
    %c29 = arith.constant 29 : index
    %c0_10 = arith.constant 0 : index
    %21 = vector.load %arg7[%c29, %c0_10] : memref<102x4xbf16, #tpu.memory_space<vmem>>, vector<2x4xbf16>
    tpu.vector_store %arg7[%c29, %c0_10], %9 {strides = array<i32>} : memref<102x4xbf16, #tpu.memory_space<vmem>>, vector<2x4xbf16>,
    %22 = vector.extract_strided_slice %8 {offsets = [2, 0, 0], sizes = [1, 8, 4], strides = [1, 1, 1]} : vector<8x8x4xf32> to vector<1x8x4xf32>
    %23 = vector.shape_cast %22 : vector<1x8x4xf32> to vector<8x4xf32>
    %24 = arith.truncf %23 : vector<8x4xf32> to vector<8x4xbf16>
    %c31 = arith.constant 31 : index
    %c0_11 = arith.constant 0 : index
    %25 = vector.load %arg7[%c31, %c0_11] : memref<102x4xbf16, #tpu.memory_space<vmem>>, vector<8x4xbf16>
    tpu.vector_store %arg7[%c31, %c0_11], %24 {strides = array<i32>} : memref<102x4xbf16, #tpu.memory_space<vmem>>, vector<8x4xbf16>,
    %c39 = arith.constant 39 : index
    %c0_12 = arith.constant 0 : index
    %26 = vector.load %arg7[%c39, %c0_12] : memref<102x4xbf16, #tpu.memory_space<vmem>>, vector<2x4xbf16>
    tpu.vector_store %arg7[%c39, %c0_12], %9 {strides = array<i32>} : memref<102x4xbf16, #tpu.memory_space<vmem>>, vector<2x4xbf16>,
    %27 = vector.extract_strided_slice %8 {offsets = [3, 0, 0], sizes = [1, 8, 4], strides = [1, 1, 1]} : vector<8x8x4xf32> to vector<1x8x4xf32>
    %28 = vector.shape_cast %27 : vector<1x8x4xf32> to vector<8x4xf32>
    %29 = arith.truncf %28 : vector<8x4xf32> to vector<8x4xbf16>
    %c41 = arith.constant 41 : index
    %c0_13 = arith.constant 0 : index
    %30 = vector.load %arg7[%c41, %c0_13] : memref<102x4xbf16, #tpu.memory_space<vmem>>, vector<8x4xbf16>
    tpu.vector_store %arg7[%c41, %c0_13], %29 {strides = array<i32>} : memref<102x4xbf16, #tpu.memory_space<vmem>>, vector<8x4xbf16>,
    %c49 = arith.constant 49 : index
    %c0_14 = arith.constant 0 : index
    %31 = vector.load %arg7[%c49, %c0_14] : memref<102x4xbf16, #tpu.memory_space<vmem>>, vector<2x4xbf16>
    tpu.vector_store %arg7[%c49, %c0_14], %9 {strides = array<i32>} : memref<102x4xbf16, #tpu.memory_space<vmem>>, vector<2x4xbf16>,
    %32 = vector.extract_strided_slice %8 {offsets = [4, 0, 0], sizes = [1, 8, 4], strides = [1, 1, 1]} : vector<8x8x4xf32> to vector<1x8x4xf32>
    %33 = vector.shape_cast %32 : vector<1x8x4xf32> to vector<8x4xf32>
    %34 = arith.truncf %33 : vector<8x4xf32> to vector<8x4xbf16>
    %c51 = arith.constant 51 : index
    %c0_15 = arith.constant 0 : index
    %35 = vector.load %arg7[%c51, %c0_15] : memref<102x4xbf16, #tpu.memory_space<vmem>>, vector<8x4xbf16>
    tpu.vector_store %arg7[%c51, %c0_15], %34 {strides = array<i32>} : memref<102x4xbf16, #tpu.memory_space<vmem>>, vector<8x4xbf16>,
    %c59 = arith.constant 59 : index
    %c0_16 = arith.constant 0 : index
    %36 = vector.load %arg7[%c59, %c0_16] : memref<102x4xbf16, #tpu.memory_space<vmem>>, vector<2x4xbf16>
    tpu.vector_store %arg7[%c59, %c0_16], %9 {strides = array<i32>} : memref<102x4xbf16, #tpu.memory_space<vmem>>, vector<2x4xbf16>,
    %37 = vector.extract_strided_slice %8 {offsets = [5, 0, 0], sizes = [1, 8, 4], strides = [1, 1, 1]} : vector<8x8x4xf32> to vector<1x8x4xf32>
    %38 = vector.shape_cast %37 : vector<1x8x4xf32> to vector<8x4xf32>
    %39 = arith.truncf %38 : vector<8x4xf32> to vector<8x4xbf16>
    %c61 = arith.constant 61 : index
    %c0_17 = arith.constant 0 : index
    %40 = vector.load %arg7[%c61, %c0_17] : memref<102x4xbf16, #tpu.memory_space<vmem>>, vector<8x4xbf16>
    tpu.vector_store %arg7[%c61, %c0_17], %39 {strides = array<i32>} : memref<102x4xbf16, #tpu.memory_space<vmem>>, vector<8x4xbf16>,
    %c69 = arith.constant 69 : index
    %c0_18 = arith.constant 0 : index
    %41 = vector.load %arg7[%c69, %c0_18] : memref<102x4xbf16, #tpu.memory_space<vmem>>, vector<2x4xbf16>
    tpu.vector_store %arg7[%c69, %c0_18], %9 {strides = array<i32>} : memref<102x4xbf16, #tpu.memory_space<vmem>>, vector<2x4xbf16>,
    %42 = vector.extract_strided_slice %8 {offsets = [6, 0, 0], sizes = [1, 8, 4], strides = [1, 1, 1]} : vector<8x8x4xf32> to vector<1x8x4xf32>
    %43 = vector.shape_cast %42 : vector<1x8x4xf32> to vector<8x4xf32>
    %44 = arith.truncf %43 : vector<8x4xf32> to vector<8x4xbf16>
    %c71 = arith.constant 71 : index
    %c0_19 = arith.constant 0 : index
    %45 = vector.load %arg7[%c71, %c0_19] : memref<102x4xbf16, #tpu.memory_space<vmem>>, vector<8x4xbf16>
    tpu.vector_store %arg7[%c71, %c0_19], %44 {strides = array<i32>} : memref<102x4xbf16, #tpu.memory_space<vmem>>, vector<8x4xbf16>,
    %c79 = arith.constant 79 : index
    %c0_20 = arith.constant 0 : index
    %46 = vector.load %arg7[%c79, %c0_20] : memref<102x4xbf16, #tpu.memory_space<vmem>>, vector<2x4xbf16>
    tpu.vector_store %arg7[%c79, %c0_20], %9 {strides = array<i32>} : memref<102x4xbf16, #tpu.memory_space<vmem>>, vector<2x4xbf16>,
    %47 = vector.extract_strided_slice %8 {offsets = [7, 0, 0], sizes = [1, 8, 4], strides = [1, 1, 1]} : vector<8x8x4xf32> to vector<1x8x4xf32>
    %48 = vector.shape_cast %47 : vector<1x8x4xf32> to vector<8x4xf32>
    %49 = arith.truncf %48 : vector<8x4xf32> to vector<8x4xbf16>
    %c81 = arith.constant 81 : index
    %c0_21 = arith.constant 0 : index
    %50 = vector.load %arg7[%c81, %c0_21] : memref<102x4xbf16, #tpu.memory_space<vmem>>, vector<8x4xbf16>
    tpu.vector_store %arg7[%c81, %c0_21], %49 {strides = array<i32>} : memref<102x4xbf16, #tpu.memory_space<vmem>>, vector<8x4xbf16>,
    %c89 = arith.constant 89 : index
    %c0_22 = arith.constant 0 : index
    %51 = vector.load %arg7[%c89, %c0_22] : memref<102x4xbf16, #tpu.memory_space<vmem>>, vector<2x4xbf16>
    tpu.vector_store %arg7[%c89, %c0_22], %9 {strides = array<i32>} : memref<102x4xbf16, #tpu.memory_space<vmem>>, vector<2x4xbf16>,
    %cst_23 = arith.constant 0.000000e+00 : bf16
    %52 = vector.broadcast %cst_23 : bf16 to vector<11x4xbf16>
    %c91 = arith.constant 91 : index
    %c0_24 = arith.constant 0 : index
    %53 = vector.load %arg7[%c91, %c0_24] : memref<102x4xbf16, #tpu.memory_space<vmem>>, vector<11x4xbf16>
    tpu.vector_store %arg7[%c91, %c0_24], %52 {strides = array<i32>} : memref<102x4xbf16, #tpu.memory_space<vmem>>, vector<11x4xbf16>,
    %54 = tpu.iota {dimensions = array<i32: 0>} : vector<80x1xi32>
    %c10_i32 = arith.constant 10 : i32
    %c0_i32 = arith.constant 0 : i32
    %55 = arith.cmpi eq, %c10_i32, %c0_i32 : i32
    %c1_i32 = arith.constant 1 : i32
    %56 = arith.select %55, %c1_i32, %c10_i32 : i32
    %57 = vector.broadcast %56 : i32 to vector<80x1xi32>
    %58 = arith.remsi %54, %57 : vector<80x1xi32>
    %c0_i32_25 = arith.constant 0 : i32
    %59 = vector.broadcast %c0_i32_25 : i32 to vector<80x1xi32>
    %60 = arith.cmpi ne, %58, %59 : vector<80x1xi32>
    %c0_i32_26 = arith.constant 0 : i32
    %61 = vector.broadcast %c0_i32_26 : i32 to vector<80x1xi32>
    %62 = arith.cmpi slt, %58, %61 : vector<80x1xi32>
    %c0_i32_27 = arith.constant 0 : i32
    %63 = arith.cmpi slt, %56, %c0_i32_27 : i32
    %64 = vector.broadcast %63 : i1 to vector<80x1xi1>
    %65 = vector.broadcast %64 : vector<80x1xi1> to vector<80x1xi1>
    %66 = arith.xori %62, %65 : vector<80x1xi1>
    %67 = arith.andi %66, %60 : vector<80x1xi1>
    %68 = vector.broadcast %56 : i32 to vector<80x1xi32>
    %69 = arith.addi %58, %68 : vector<80x1xi32>
    %70 = arith.select %67, %69, %58 : vector<80x1xi1>, vector<80x1xi32>
    %c8_i32 = arith.constant 8 : i32
    %71 = vector.broadcast %c8_i32 : i32 to vector<80x1xi32>
    %72 = arith.cmpi slt, %70, %71 : vector<80x1xi32>
    %cst_28 = arith.constant 0.000000e+00 : f32
    %73 = vector.broadcast %cst_28 : f32 to vector<80x8xf32>
    %c0_29 = arith.constant 0 : index
    %c0_30 = arith.constant 0 : index
    %74 = vector.load %arg7[%c0_29, %c0_30] : memref<102x4xbf16, #tpu.memory_space<vmem>>, vector<80x4xbf16>
    %c1 = arith.constant 1 : index
    %c0_31 = arith.constant 0 : index
    %75 = vector.load %arg7[%c1, %c0_31] : memref<102x4xbf16, #tpu.memory_space<vmem>>, vector<80x4xbf16>
    %c2 = arith.constant 2 : index
    %c0_32 = arith.constant 0 : index
    %76 = vector.load %arg7[%c2, %c0_32] : memref<102x4xbf16, #tpu.memory_space<vmem>>, vector<80x4xbf16>
    %77 = tpu.concatenate %74, %75, %76 in 1 : vector<80x4xbf16>, vector<80x4xbf16>, vector<80x4xbf16> -> vector<80x12xbf16>
    %c0_33 = arith.constant 0 : index
    %c0_34 = arith.constant 0 : index
    %78 = vector.load %arg2[%c0_33, %c0_34] : memref<36x8xbf16, #tpu.memory_space<vmem>>, vector<12x8xbf16>
    %cst_35 = arith.constant dense<0.000000e+00> : vector<80x8xf32>
    %79 = tpu.matmul %77, %78, %cst_35 {dimension_numbers = #tpu.dot_dimension_numbers<[1], [0], [0], [1], [0, 0, 1, 1], [], []>} : vector<80x12xbf16>, vector<12x8xbf16>, vector<80x8xf32> -> vector<80x8xf32>
    %80 = arith.addf %73, %79 : vector<80x8xf32>
    %c10 = arith.constant 10 : index
    %c0_36 = arith.constant 0 : index
    %81 = vector.load %arg7[%c10, %c0_36] : memref<102x4xbf16, #tpu.memory_space<vmem>>, vector<80x4xbf16>
    %c11_37 = arith.constant 11 : index
    %c0_38 = arith.constant 0 : index
    %82 = vector.load %arg7[%c11_37, %c0_38] : memref<102x4xbf16, #tpu.memory_space<vmem>>, vector<80x4xbf16>
    %c12 = arith.constant 12 : index
    %c0_39 = arith.constant 0 : index
    %83 = vector.load %arg7[%c12, %c0_39] : memref<102x4xbf16, #tpu.memory_space<vmem>>, vector<80x4xbf16>
    %84 = tpu.concatenate %81, %82, %83 in 1 : vector<80x4xbf16>, vector<80x4xbf16>, vector<80x4xbf16> -> vector<80x12xbf16>
    %c12_40 = arith.constant 12 : index
    %c0_41 = arith.constant 0 : index
    %85 = vector.load %arg2[%c12_40, %c0_41] : memref<36x8xbf16, #tpu.memory_space<vmem>>, vector<12x8xbf16>
    %cst_42 = arith.constant dense<0.000000e+00> : vector<80x8xf32>
    %86 = tpu.matmul %84, %85, %cst_42 {dimension_numbers = #tpu.dot_dimension_numbers<[1], [0], [0], [1], [0, 0, 1, 1], [], []>} : vector<80x12xbf16>, vector<12x8xbf16>, vector<80x8xf32> -> vector<80x8xf32>
    %87 = arith.addf %80, %86 : vector<80x8xf32>
    %c20 = arith.constant 20 : index
    %c0_43 = arith.constant 0 : index
    %88 = vector.load %arg7[%c20, %c0_43] : memref<102x4xbf16, #tpu.memory_space<vmem>>, vector<80x4xbf16>
    %c21_44 = arith.constant 21 : index
    %c0_45 = arith.constant 0 : index
    %89 = vector.load %arg7[%c21_44, %c0_45] : memref<102x4xbf16, #tpu.memory_space<vmem>>, vector<80x4xbf16>
    %c22 = arith.constant 22 : index
    %c0_46 = arith.constant 0 : index
    %90 = vector.load %arg7[%c22, %c0_46] : memref<102x4xbf16, #tpu.memory_space<vmem>>, vector<80x4xbf16>
    %91 = tpu.concatenate %88, %89, %90 in 1 : vector<80x4xbf16>, vector<80x4xbf16>, vector<80x4xbf16> -> vector<80x12xbf16>
    %c24 = arith.constant 24 : index
    %c0_47 = arith.constant 0 : index
    %92 = vector.load %arg2[%c24, %c0_47] : memref<36x8xbf16, #tpu.memory_space<vmem>>, vector<12x8xbf16>
    %cst_48 = arith.constant dense<0.000000e+00> : vector<80x8xf32>
    %93 = tpu.matmul %91, %92, %cst_48 {dimension_numbers = #tpu.dot_dimension_numbers<[1], [0], [0], [1], [0, 0, 1, 1], [], []>} : vector<80x12xbf16>, vector<12x8xbf16>, vector<80x8xf32> -> vector<80x8xf32>
    %94 = arith.addf %87, %93 : vector<80x8xf32>
    %c0_49 = arith.constant 0 : index
    %c0_50 = arith.constant 0 : index
    %95 = vector.load %arg3[%c0_49, %c0_50] : memref<1x8xf32, #tpu.memory_space<vmem>>, vector<1x8xf32>
    %96 = vector.broadcast %95 : vector<1x8xf32> to vector<80x8xf32>
    %97 = arith.addf %94, %96 : vector<80x8xf32>
    %cst_51 = arith.constant 0.000000e+00 : f32
    %98 = vector.broadcast %cst_51 : f32 to vector<80x8xf32>
    %99 = arith.maximumf %97, %98 : vector<80x8xf32>
    %cst_52 = arith.constant 0.000000e+00 : f32
    %100 = vector.shape_cast %72 : vector<80x1xi1> to vector<80x1xi1>
    %101 = vector.broadcast %100 : vector<80x1xi1> to vector<80x8xi1>
    %102 = vector.broadcast %cst_52 : f32 to vector<80x8xf32>
    %103 = arith.select %101, %99, %102 : vector<80x8xi1>, vector<80x8xf32>
    %cst_53 = arith.constant 0.000000e+00 : bf16
    %104 = vector.broadcast %cst_53 : bf16 to vector<11x8xbf16>
    %c0_54 = arith.constant 0 : index
    %c0_55 = arith.constant 0 : index
    %105 = vector.load %arg8[%c0_54, %c0_55] : memref<102x8xbf16, #tpu.memory_space<vmem>>, vector<11x8xbf16>
    tpu.vector_store %arg8[%c0_54, %c0_55], %104 {strides = array<i32>} : memref<102x8xbf16, #tpu.memory_space<vmem>>, vector<11x8xbf16>,
    %106 = arith.truncf %103 : vector<80x8xf32> to vector<80x8xbf16>
    %c11_56 = arith.constant 11 : index
    %c0_57 = arith.constant 0 : index
    %107 = vector.load %arg8[%c11_56, %c0_57] : memref<102x8xbf16, #tpu.memory_space<vmem>>, vector<80x8xbf16>
    tpu.vector_store %arg8[%c11_56, %c0_57], %106 {strides = array<i32>} : memref<102x8xbf16, #tpu.memory_space<vmem>>, vector<80x8xbf16>,
    %cst_58 = arith.constant 0.000000e+00 : bf16
    %108 = vector.broadcast %cst_58 : bf16 to vector<11x8xbf16>
    %c91_59 = arith.constant 91 : index
    %c0_60 = arith.constant 0 : index
    %109 = vector.load %arg8[%c91_59, %c0_60] : memref<102x8xbf16, #tpu.memory_space<vmem>>, vector<11x8xbf16>
    tpu.vector_store %arg8[%c91_59, %c0_60], %108 {strides = array<i32>} : memref<102x8xbf16, #tpu.memory_space<vmem>>, vector<11x8xbf16>,
    %cst_61 = arith.constant 0.000000e+00 : f32
    %110 = vector.broadcast %cst_61 : f32 to vector<80x8xf32>
    %c0_62 = arith.constant 0 : index
    %c0_63 = arith.constant 0 : index
    %111 = vector.load %arg8[%c0_62, %c0_63] : memref<102x8xbf16, #tpu.memory_space<vmem>>, vector<80x8xbf16>
    %c1_64 = arith.constant 1 : index
    %c0_65 = arith.constant 0 : index
    %112 = vector.load %arg8[%c1_64, %c0_65] : memref<102x8xbf16, #tpu.memory_space<vmem>>, vector<80x8xbf16>
    %c2_66 = arith.constant 2 : index
    %c0_67 = arith.constant 0 : index
    %113 = vector.load %arg8[%c2_66, %c0_67] : memref<102x8xbf16, #tpu.memory_space<vmem>>, vector<80x8xbf16>
    %114 = tpu.concatenate %111, %112, %113 in 1 : vector<80x8xbf16>, vector<80x8xbf16>, vector<80x8xbf16> -> vector<80x24xbf16>
    %c0_68 = arith.constant 0 : index
    %c0_69 = arith.constant 0 : index
    %115 = vector.load %arg4[%c0_68, %c0_69] : memref<72x8xbf16, #tpu.memory_space<vmem>>, vector<24x8xbf16>
    %cst_70 = arith.constant dense<0.000000e+00> : vector<80x8xf32>
    %116 = tpu.matmul %114, %115, %cst_70 {dimension_numbers = #tpu.dot_dimension_numbers<[1], [0], [0], [1], [0, 0, 1, 1], [], []>} : vector<80x24xbf16>, vector<24x8xbf16>, vector<80x8xf32> -> vector<80x8xf32>
    %117 = arith.addf %110, %116 : vector<80x8xf32>
    %c10_71 = arith.constant 10 : index
    %c0_72 = arith.constant 0 : index
    %118 = vector.load %arg8[%c10_71, %c0_72] : memref<102x8xbf16, #tpu.memory_space<vmem>>, vector<80x8xbf16>
    %c11_73 = arith.constant 11 : index
    %c0_74 = arith.constant 0 : index
    %119 = vector.load %arg8[%c11_73, %c0_74] : memref<102x8xbf16, #tpu.memory_space<vmem>>, vector<80x8xbf16>
    %c12_75 = arith.constant 12 : index
    %c0_76 = arith.constant 0 : index
    %120 = vector.load %arg8[%c12_75, %c0_76] : memref<102x8xbf16, #tpu.memory_space<vmem>>, vector<80x8xbf16>
    %121 = tpu.concatenate %118, %119, %120 in 1 : vector<80x8xbf16>, vector<80x8xbf16>, vector<80x8xbf16> -> vector<80x24xbf16>
    %c24_77 = arith.constant 24 : index
    %c0_78 = arith.constant 0 : index
    %122 = vector.load %arg4[%c24_77, %c0_78] : memref<72x8xbf16, #tpu.memory_space<vmem>>, vector<24x8xbf16>
    %cst_79 = arith.constant dense<0.000000e+00> : vector<80x8xf32>
    %123 = tpu.matmul %121, %122, %cst_79 {dimension_numbers = #tpu.dot_dimension_numbers<[1], [0], [0], [1], [0, 0, 1, 1], [], []>} : vector<80x24xbf16>, vector<24x8xbf16>, vector<80x8xf32> -> vector<80x8xf32>
    %124 = arith.addf %117, %123 : vector<80x8xf32>
    %c20_80 = arith.constant 20 : index
    %c0_81 = arith.constant 0 : index
    %125 = vector.load %arg8[%c20_80, %c0_81] : memref<102x8xbf16, #tpu.memory_space<vmem>>, vector<80x8xbf16>
    %c21_82 = arith.constant 21 : index
    %c0_83 = arith.constant 0 : index
    %126 = vector.load %arg8[%c21_82, %c0_83] : memref<102x8xbf16, #tpu.memory_space<vmem>>, vector<80x8xbf16>
    %c22_84 = arith.constant 22 : index
    %c0_85 = arith.constant 0 : index
    %127 = vector.load %arg8[%c22_84, %c0_85] : memref<102x8xbf16, #tpu.memory_space<vmem>>, vector<80x8xbf16>
    %128 = tpu.concatenate %125, %126, %127 in 1 : vector<80x8xbf16>, vector<80x8xbf16>, vector<80x8xbf16> -> vector<80x24xbf16>
    %c48 = arith.constant 48 : index
    %c0_86 = arith.constant 0 : index
    %129 = vector.load %arg4[%c48, %c0_86] : memref<72x8xbf16, #tpu.memory_space<vmem>>, vector<24x8xbf16>
    %cst_87 = arith.constant dense<0.000000e+00> : vector<80x8xf32>
    %130 = tpu.matmul %128, %129, %cst_87 {dimension_numbers = #tpu.dot_dimension_numbers<[1], [0], [0], [1], [0, 0, 1, 1], [], []>} : vector<80x24xbf16>, vector<24x8xbf16>, vector<80x8xf32> -> vector<80x8xf32>
    %131 = arith.addf %124, %130 : vector<80x8xf32>
    %c0_88 = arith.constant 0 : index
    %c0_89 = arith.constant 0 : index
    %132 = vector.load %arg5[%c0_88, %c0_89] : memref<1x8xf32, #tpu.memory_space<vmem>>, vector<1x8xf32>
    %133 = vector.broadcast %132 : vector<1x8xf32> to vector<80x8xf32>
    %134 = arith.addf %131, %133 : vector<80x8xf32>
    %cst_90 = arith.constant 0.000000e+00 : f32
    %135 = vector.broadcast %cst_90 : f32 to vector<80x8xf32>
    %136 = arith.maximumf %134, %135 : vector<80x8xf32>
    %cst_91 = arith.constant 0.000000e+00 : f32
    %137 = vector.shape_cast %72 : vector<80x1xi1> to vector<80x1xi1>
    %138 = vector.broadcast %137 : vector<80x1xi1> to vector<80x8xi1>
    %139 = vector.broadcast %cst_91 : f32 to vector<80x8xf32>
    %140 = arith.select %138, %136, %139 : vector<80x8xi1>, vector<80x8xf32>
    %141 = vector.shape_cast %140 : vector<80x8xf32> to vector<1x80x8xf32>
    %c0_92 = arith.constant 0 : index
    %c0_93 = arith.constant 0 : index
    %c0_94 = arith.constant 0 : index
    %142 = vector.load %arg6[%c0_92, %c0_93, %c0_94] : memref<1x80x8xf32, #tpu.memory_space<vmem>>, vector<1x80x8xf32>
    tpu.vector_store %arg6[%c0_92, %c0_93, %c0_94], %141 {strides = array<i32>} : memref<1x80x8xf32, #tpu.memory_space<vmem>>, vector<1x80x8xf32>,
    return
  }
  func.func @transform_0(%arg0: i32) -> (i32, i32, i32, i32, i32) {
    %c0_i32 = arith.constant 0 : i32
    %c0_i32_0 = arith.constant 0 : i32
    %c0_i32_1 = arith.constant 0 : i32
    %c0_i32_2 = arith.constant 0 : i32
    %c0_i32_3 = arith.constant 0 : i32
    return %arg0, %c0_i32, %c0_i32_0, %c0_i32_1, %c0_i32_2 : i32, i32, i32, i32, i32
  }
  func.func @transform_1(%arg0: i32) -> (i32, i32) {
    %c0_i32 = arith.constant 0 : i32
    %c0_i32_0 = arith.constant 0 : i32
    %c0_i32_1 = arith.constant 0 : i32
    return %c0_i32, %c0_i32_0 : i32, i32
  }
  func.func @transform_2(%arg0: i32) -> (i32, i32) {
    %c0_i32 = arith.constant 0 : i32
    %c0_i32_0 = arith.constant 0 : i32
    %c0_i32_1 = arith.constant 0 : i32
    return %c0_i32, %c0_i32_0 : i32, i32
  }
  func.func @transform_3(%arg0: i32) -> (i32, i32) {
    %c0_i32 = arith.constant 0 : i32
    %c0_i32_0 = arith.constant 0 : i32
    %c0_i32_1 = arith.constant 0 : i32
    return %c0_i32, %c0_i32_0 : i32, i32
  }
  func.func @transform_4(%arg0: i32) -> (i32, i32) {
    %c0_i32 = arith.constant 0 : i32
    %c0_i32_0 = arith.constant 0 : i32
    %c0_i32_1 = arith.constant 0 : i32
    return %c0_i32, %c0_i32_0 : i32, i32
  }
  func.func @transform_5(%arg0: i32) -> (i32, i32, i32) {
    %c0_i32 = arith.constant 0 : i32
    %c0_i32_0 = arith.constant 0 : i32
    %c0_i32_1 = arith.constant 0 : i32
    return %arg0, %c0_i32, %c0_i32_0 : i32, i32, i32
  }
}

</mosaic_0001>

<bundles_post_ra>
// kernel: down_forward.1
= control target key start
LH: loop header
LB: loop body
LE: loop exit
PB: predicated region body
PF: predicated region fallthrough
CT: control target
= control target key end

     0   :  { %s3035_s18 = smov 0   ;;  %s4285_s0 = inlined_call_operand.vmem [shape: f32[2,8,2,8,8], index: 0, kind: input, shape index: {}]   ;;  %s4286_s1 = inlined_call_operand.vmem [shape: bf16[36,8], index: 1, kind: input, shape index: {}]   ;;  %s4287_s2 = inlined_call_operand.vmem [shape: f32[1,8], index: 2, kind: input, shape index: {}]   ;;  %s4288_s3 = inlined_call_operand.vmem [shape: bf16[72,8], index: 3, kind: input, shape index: {}]   ;;  %s4289_s4 = inlined_call_operand.vmem [shape: f32[1,8], index: 4, kind: input, shape index: {}]   ;;  %s4290_s5 = inlined_call_operand.vmem [shape: f32[2,80,8], index: 5, kind: output, shape index: {}]  }
   0x1 LB: > { %s2573_s19 = sadd.s32 4294967295, %s2996_s18   ;;  %p2577_p0 = scmp.ge.s32.totalorder %s2996_s18, 1  ;;  %s2996_s18 = sphi %s3035_s18, %s15_s18  }
   0x2   : > { %p187_p1 = scmp.lt.s32.totalorder %s2996_s18, 3 }
   0x4   : > { %p188_p2 = pnand %p2577_p0, %p187_p1 }
   0x5   : > { %p215_p3 = scmp.lt.s32.totalorder (!%p188_p2), %s2573_s19, 1  ;;  %vm292_vm0 = vcmask (!%p188_p2), 25600   ;;  %vm293_vm1 = vsmask.f32 (!%p188_p2), 1280  ;;  %v295_v1 = vld [vmem:[#allocation2 + $0x4] sm:$0x3] (!%p188_p2) }
   0x6   : > { %191 = sbr.rel (%p188_p2) target bundleno = 1031 (0x407), region = 40  ;;  %vm3045_vm2 = vmand (!%p188_p2), %vm292_vm0, %vm293_vm1  ;;  %vm390_vm3 = vcmask (!%p188_p2), 24576   ;;  %vm391_vm4 = vsmask.f32 (!%p188_p2), 256  ;;  %vm290_vm5 = vcmask (!%p188_p2), 27648   ;;  %s2998_s24 = smov (!%p188_p2), 124  }
   0x7   : > { %v296_v2 = vsel (!%p188_p2), %vm3045_vm2, 0, %v295_v1  ;;  %vm3057_vm6 = vmand (!%p188_p2), %vm390_vm3, %vm391_vm4  ;;  %vm349_vm7 = vcmask (!%p188_p2), 26624   ;;  %v393_v27 = vld [vmem:[#allocation2 + $0x14] sm:$0x1] (!%p188_p2)  ;;  %v2999_v31 = vmov (!%p188_p2), 0   ;;  %vm4291_vm8 = vcmask (!%p188_p2), 60416  }
   0x8   : > { %297 = vst [vmem:[#allocation2 + $0x4] sm:$0x3] (!%p188_p2), %v296_v2  ;;  %291 = vst.msk [vmem:[#allocation2] sm:$0xf] (!%p188_p2), %vm290_vm5, %v2999_v31  ;;  %v394_v32 = vsel (!%p188_p2), %vm3057_vm6, 0, %v393_v27  ;;  %vm1696_vm9 = vcmask (!%p188_p2), 59392  }
   0x9   : > { %525 = vst.msk [vmem:[#allocation2 + $0x30] sm:$0x7] (!%p188_p2), %vm349_vm7, %v2999_v31  ;;  %395 = vst [vmem:[#allocation2 + $0x14] sm:$0x1] (!%p188_p2), %v394_v32  ;;  %v495_v34 = vld [vmem:[#allocation2 + $0x28] sm:$0x1] (!%p188_p2) }
   0xa   : > { %1528 = vst.msk [vmem:[#allocation3] sm:$0xf] (!%p188_p2), %vm4291_vm8, %v2999_v31  ;;  %v496_v35 = vsel (!%p188_p2), %vm3057_vm6, 0, %v495_v34  ;;  %vm382_vm10 = vsmask.f32 (!%p188_p2), 3328  ;;  %vm313_vm11 = vcmask (!%p188_p2), 27649  }
   0xb   : > { %1697 = vst.msk [vmem:[#allocation3 + $0x30] sm:$0x7] (!%p188_p2), %vm1696_vm9, %v2999_v31  ;;  %497 = vst [vmem:[#allocation2 + $0x28] sm:$0x1] (!%p188_p2), %v496_v35  ;;  %vm4292_vm12 = vsmask.f32 (!%p188_p2), 7942 }
   0xc   : > { %vm350_vm13 = vsmask.f32 (!%p188_p2), 2304  ;;  %vm410_vm14 = vsmask.f32 (!%p188_p2), 7938  ;;  %vm322_vm15 = vcmask (!%p188_p2), 26625   ;;  %vm3081_vm4 = vmand (!%p188_p2), %vm313_vm11, %vm4292_vm12  ;;  %s3001_s25 = smov (!%p188_p2), 4  }
   0xd   : > { %s4457_s19 = smov (!%p215_p3, %s2573_s19), 1  ;;  %vm323_vm3 = vsmask.f32 2310  ;;  %vm3087_vm9 = vmand %vm290_vm5, %vm382_vm10  ;;  %vm355_vm8 = vsmask.f32 3338  ;;  %s3002_s26 = smov 8  }
   0xe   : > { %s2688_s20 = sshll.u32 %s4457_s19, 7  ;;  %vm3096_vm11 = vmand %vm349_vm7, %vm350_vm13  ;;  %vm343_vm7 = vcmask 27650   ;;  %vm376_vm13 = vsmask.f32 7950  ;;  %s3004_s16 = smov 16  }
   0xf   : > { %s219_s23 = scalar_lea.vmem %s4285_s0, %s2688_s20  ;;  %vm3115_vm10 = vmand %vm290_vm5, %vm410_vm14  ;;  %vm418_vm5 = vsmask.f32 1282  ;;  %s2884_s27 = smul.u32 80, %s4457_s19 }
  0x10   : > { %v230_v3 = vld [vmem:[%s219_s23 + $0x20] sm:$0xff]  ;;  %v231_v4 = vld [vmem:[%s219_s23 + $0x28] sm:$0xff]  ;;  %v228_v11 = vld [vmem:[%s219_s23 + $0x10] sm:$0xff] }
  0x11   : > { %v234_v5 = vld [vmem:[%s219_s23 + $0x40] sm:$0xff]  ;;  %v235_v6 = vld [vmem:[%s219_s23 + $0x48] sm:$0xff]  ;;  %v244_v7 = vmax.f32 %v230_v3, %v231_v4  ;;  %v229_v12 = vld [vmem:[%s219_s23 + $0x18] sm:$0xff]  ;;  %s4228_s30 = scalar_lea.vmem %s4290_s5, %s2884_s27 }
  0x12   : > { %v226_v8 = vld [vmem:[%s219_s23] sm:$0xff]  ;;  %v227_v9 = vld [vmem:[%s219_s23 + $0x8] sm:$0xff]  ;;  %v246_v10 = vmax.f32 %v234_v5, %v235_v6  ;;  %v236_v14 = vld [vmem:[%s219_s23 + $0x50] sm:$0xff]  ;;  %v243_v15 = vmax.f32 %v228_v11, %v229_v12 }
  0x13   : > { %v242_v13 = vmax.f32 %v226_v8, %v227_v9  ;;  %v237_v16 = vld [vmem:[%s219_s23 + $0x58] sm:$0xff]  ;;  %v232_v17 = vld [vmem:[%s219_s23 + $0x30] sm:$0xff]  ;;  %v238_v20 = vld [vmem:[%s219_s23 + $0x60] sm:$0xff] }
  0x14   : > { %v233_v18 = vld [vmem:[%s219_s23 + $0x38] sm:$0xff]  ;;  %v2925_v19 = vpack.i.bf16 %v246_v10, %v244_v7  ;;  %v239_v21 = vld [vmem:[%s219_s23 + $0x68] sm:$0xff]  ;;  %v240_v22 = vld [vmem:[%s219_s23 + $0x70] sm:$0xff]  ;;  %v247_v26 = vmax.f32 %v236_v14, %v237_v16 }
  0x15   : > { %v2920_v23 = vpack.i.bf16 %v243_v15, %v242_v13  ;;  %v241_v24 = vld [vmem:[%s219_s23 + $0x78] sm:$0xff]  ;;  %v245_v28 = vmax.f32 %v232_v17, %v233_v18  ;;  %v3061_v29 = vmax.f32 %v238_v20, %v239_v21  ;;  %v384_v8 = vld [vmem:[#allocation2 + $0x10] sm:$0xf]  ;;  %v316_v12 = vld [vmem:[#allocation2 + $0x4] sm:$0xe] }
  0x16   : > { %2926 = vrot.lane.b32.xlu1 %v2925_v19, %s2998_s24  ;;  %v3063_v30 = vmax.f32 %v240_v22, %v241_v24  ;;  %v441_v16 = vld [vmem:[#allocation2 + $0x1c] sm:$0x3]  ;;  %v319_v17 = vld [vmem:[#allocation2 + $0x8] sm:$0x3]  ;;  %vm3124_vm14 = vmand %vm322_vm15, %vm323_vm3  ;;  %vm344_vm3 = vsmask.f32 7946 }
  0x17   : > { %2921 = vrot.lane.b32.xlu0 %v2920_v23, %s2998_s24  ;;  %vm3140_vm15 = vmand %vm343_vm7, %vm355_vm8 }
  0x18   : > { %v2930_v33 = vpack.i.bf16 %v3063_v30, %v3061_v29  ;;  %vm3154_vm8 = vmand %vm292_vm0, %vm418_vm5 }
  0x19   : > { %vm345_vm0 = vmand %vm343_vm7, %vm344_vm3  ;;  %vm4296_vm7 = vcmask 64512  }
  0x1a   : > { %268 = vrot.lane.b32.xlu1 %v247_v26, %s2998_s24 }
  0x1b   : > { %264 = vrot.lane.b32.xlu0 %v245_v28, %s2998_s24 }
  0x1f   : > { %2931 = vrot.lane.b32.xlu0 %v2930_v33, %s2998_s24 }
  0x88   : > { %v2927_v36 = vpop.permute.xlu1 %2926 }
  0x89   : > { %v2929_v37 = vunpack.i.h.bf16 %v2927_v36  ;;  %v2928_v38 = vunpack.i.l.bf16 %v2927_v36  ;;  %v2922_v39 = vpop.permute.xlu0 %2921 }
  0x8a   : > { %v2924_v40 = vunpack.i.h.bf16 %v2922_v39  ;;  %v2923_v41 = vunpack.i.l.bf16 %v2922_v39 }
  0x8b   : > { %v286_v42 = vmax.f32 %v246_v10, %v2929_v37  ;;  %v284_v43 = vmax.f32 %v244_v7, %v2928_v38 }
  0x8c   : > { %v283_v44 = vmax.f32 %v243_v15, %v2924_v40  ;;  %v282_v45 = vmax.f32 %v242_v13, %v2923_v41  ;;  %v269_v46 = vpop.permute.xlu1 %268 }
  0x8d   : > { %v2693_v47 = vpack.c.bf16 %v286_v42, %v286_v42  ;;  %v2691_v48 = vpack.c.bf16 %v284_v43, %v284_v43  ;;  %v265_v49 = vpop.permute.xlu0 %264  ;;  %v287_v52 = vmax.f32 %v247_v26, %v269_v46  ;;  %v352_v26 = vld [vmem:[#allocation2 + $0xc] sm:$0x7]  ;;  %v415_v46 = vld [vmem:[#allocation2 + $0x18] sm:$0x1] }
  0x8e   : > { %v2690_v50 = vpack.c.bf16 %v283_v44, %v283_v44  ;;  %v2689_v51 = vpack.c.bf16 %v282_v45, %v282_v45  ;;  %v285_v53 = vmax.f32 %v245_v28, %v265_v49  ;;  %v412_v45 = vld [vmem:[#allocation2 + $0x14] sm:$0xf] }
  0x8f   : > { %v428_v54 = vshrl.u32 %v2693_v47, 16  ;;  %v431_v55 = vshll.u32 %v2693_v47, 16  ;;  %v365_v56 = vshll.u32 %v2691_v48, 16  ;;  %v368_v57 = vshrl.u32 %v2691_v48, 16  ;;  %v465_v48 = vld [vmem:[#allocation2 + $0x20] sm:$0x7] }
  0x90   : > { %v333_v58 = vshrl.u32 %v2690_v50, 16  ;;  %v336_v59 = vshll.u32 %v2690_v50, 16  ;;  %v303_v60 = vshrl.u32 %v2689_v51, 16  ;;  %v306_v61 = vshll.u32 %v2689_v51, 16 }
  0x91   : > { %v430_v62 = vrot.slane %v428_v54, 6  ;;  %v433_v63 = vrot.slane %v431_v55, 7  ;;  %v3074_v1 = vrot.slane %v365_v56, 5  ;;  %v370_v2 = vrot.slane %v368_v57, 4  ;;  %v2932_v3 = vpop.permute.xlu0 %2931 }
  0x92   : > { %v335_v4 = vrot.slane %v333_v58, 5  ;;  %v338_v5 = vrot.slane %v336_v59, 6  ;;  %v305_v6 = vrot.slane %v303_v60, 6  ;;  %v308_v7 = vrot.slane %v306_v61, 7  ;;  %v512_v61 = vld [vmem:[#allocation2 + $0x28] sm:$0xf] }
  0x93   : > { %v3076_v9 = vor.u32 %v433_v63, %v430_v62  ;;  %v371_v10 = vor.u32 %v370_v2, %v3074_v1  ;;  %v2694_v13 = vpack.c.bf16 %v287_v52, %v287_v52  ;;  %v2692_v14 = vpack.c.bf16 %v285_v53, %v285_v53  ;;  %v515_v62 = vld [vmem:[#allocation2 + $0x2c] sm:$0x1] }
  0x94   : > { %v3091_v18 = vor.u32 %v338_v5, %v335_v4  ;;  %v309_v19 = vor.u32 %v308_v7, %v305_v6  ;;  %v2934_v20 = vunpack.i.h.bf16 %v2932_v3  ;;  %v2933_v21 = vunpack.i.l.bf16 %v2932_v3 }
  0x95   : > { %v435_v22 = vrot.slane %v3076_v9, 4  ;;  %v372_v23 = vrot.slane %v371_v10, 4  ;;  %v452_v27 = vshrl.u32 %v2694_v13, 16  ;;  %v455_v28 = vshll.u32 %v2694_v13, 16 }
  0x96   : > { %v340_v31 = vrot.slane %v3091_v18, 4  ;;  %v310_v32 = vrot.slane %v309_v19, 4  ;;  %v317_v33 = vsel %vm3081_vm4, %v309_v19, %v316_v12  ;;  %v401_v34 = vshrl.u32 %v2692_v14, 16 }
  0x97   : > { %v442_v35 = vsel %vm3045_vm2, %v435_v22, %v441_v16  ;;  %v385_v36 = vsel %vm3087_vm9, %v372_v23, %v384_v8  ;;  %318 = vst [vmem:[#allocation2 + $0x4] sm:$0xe] %v317_v33  ;;  %v454_v37 = vrot.slane %v452_v27, 5  ;;  %v457_v38 = vrot.slane %v455_v28, 6  ;;  %v489_v27 = vld [vmem:[#allocation2 + $0x24] sm:$0xf] }
  0x98   : > { %443 = vst [vmem:[#allocation2 + $0x1c] sm:$0x3] %v442_v35  ;;  %386 = vst [vmem:[#allocation2 + $0x10] sm:$0xf] %v385_v36  ;;  %v320_v39 = vsel %vm3045_vm2, %v310_v32, %v319_v17  ;;  %v353_v40 = vsel %vm3096_vm11, %v340_v31, %v352_v26  ;;  %v403_v41 = vrot.slane %v401_v34, 7  ;;  %v404_v42 = vshll.u32 %v2692_v14, 16 }
  0x99   : > { %321 = vst [vmem:[#allocation2 + $0x8] sm:$0x3] %v320_v39  ;;  %354 = vst [vmem:[#allocation2 + $0xc] sm:$0x7] %v353_v40  ;;  %v3111_v43 = vor.u32 %v457_v38, %v454_v37  ;;  %v289_v0 = vmax.f32 %v3063_v30, %v2934_v20  ;;  %v288_v47 = vmax.f32 %v3061_v29, %v2933_v21  ;;  %vm375_vm2 = vcmask 27651  }
  0x9a   : > { %v406_v49 = vor.u32 %v404_v42, %v403_v41  ;;  %v407_v50 = vrot.slane %v403_v41, 4  ;;  %vm3134_vm12 = vmand %vm375_vm2, %vm376_vm13  ;;  %vm1529_vm2 = vcmask 58368  }
  0x9b   : > { %v459_v51 = vrot.slane %v3111_v43, 4  ;;  %v2696_v52 = vpack.c.bf16 %v289_v0, %v289_v0  ;;  %v2695_v53 = vpack.c.bf16 %v288_v47, %v288_v47  ;;  %v3000_v0 = vmov 0.0   ;;  %vm3489_vm13 = vmand %vm1529_vm2, %vm293_vm1 }
  0x9c   : > { %v413_v29 = vsel %vm3115_vm10, %v406_v49, %v412_v45  ;;  %v416_v30 = vsel %vm3057_vm6, %v407_v50, %v415_v46  ;;  %2746 = vmatprep.subr.bf16.mxu0 %v3000_v0  ;;  %2768 = vmatprep.subr.bf16.mxu1 %v3000_v0 }
  0x9d   : > { %v466_v55 = vsel %vm3096_vm11, %v459_v51, %v465_v48  ;;  %414 = vst [vmem:[#allocation2 + $0x14] sm:$0xf] %v413_v29  ;;  %417 = vst [vmem:[#allocation2 + $0x18] sm:$0x1] %v416_v30  ;;  %v503_v57 = vshrl.u32 %v2696_v52, 16  ;;  %v506_v58 = vshll.u32 %v2696_v52, 16 }
  0x9e   : > { %v476_v59 = vshll.u32 %v2695_v53, 16  ;;  %467 = vst [vmem:[#allocation2 + $0x20] sm:$0x7] %v466_v55  ;;  %v479_v63 = vshrl.u32 %v2695_v53, 16  ;;  %v855_v52 = vld [vmem:[#allocation2 + $0x4] sm:$0xc] }
  0x9f   : > { %v444_v2 = vld [vmem:[#allocation2 + $0x1c] sm:$0x6]  ;;  %v387_v3 = vld [vmem:[#allocation2 + $0x10] sm:$0x8]  ;;  %v505_v4 = vrot.slane %v503_v57, 7  ;;  %vm827_vm11 = vcmask 31744  }
  0xa0   : > { %v478_v5 = vrot.slane %v476_v59, 5  ;;  %v325_v6 = vld [vmem:[#allocation2 + $0x8] sm:$0x6]  ;;  %v357_v7 = vld [vmem:[#allocation2 + $0xc] sm:$0xc]  ;;  %v445_v8 = vsel %vm3124_vm14, 0, %v444_v2 }
  0xa1   : > { %v388_v10 = vsel %vm3134_vm12, 0, %v387_v3  ;;  %v326_v12 = vsel %vm3124_vm14, 0, %v325_v6  ;;  %v358_v13 = vsel %vm3140_vm15, 0, %v357_v7  ;;  %446 = vst [vmem:[#allocation2 + $0x1c] sm:$0x6] %v445_v8  ;;  %v508_v14 = vor.u32 %v506_v58, %v505_v4 }
  0xa2   : > { %389 = vst [vmem:[#allocation2 + $0x10] sm:$0x8] %v388_v10  ;;  %v509_v16 = vrot.slane %v505_v4, 4  ;;  %327 = vst [vmem:[#allocation2 + $0x8] sm:$0x6] %v326_v12  ;;  %v481_v19 = vrot.slane %v479_v63, 4 }
  0xa3   : > { %359 = vst [vmem:[#allocation2 + $0xc] sm:$0xc] %v358_v13  ;;  %v513_v20 = vsel %vm3115_vm10, %v508_v14, %v512_v61  ;;  %vm1006_vm10 = vcmask 97280  }
  0xa4   : > { %v516_v21 = vsel %vm3057_vm6, %v509_v16, %v515_v62  ;;  %v420_v22 = vld [vmem:[#allocation2 + $0x18] sm:$0x3]  ;;  %514 = vst [vmem:[#allocation2 + $0x28] sm:$0xf] %v513_v20  ;;  %v482_v23 = vor.u32 %v481_v19, %v478_v5  ;;  %v3200_v50 = vld [vmem:[#allocation2 + $0x14] sm:$0xf] }
  0xa5   : > { %517 = vst [vmem:[#allocation2 + $0x2c] sm:$0x1] %v516_v21  ;;  %v468_v24 = vld [vmem:[#allocation2 + $0x20] sm:$0xc]  ;;  %v421_v26 = vsel %vm3154_vm8, 0, %v420_v22 }
  0xa6   : > { %v469_v28 = vsel %vm3140_vm15, 0, %v468_v24  ;;  %422 = vst [vmem:[#allocation2 + $0x18] sm:$0x3] %v421_v26  ;;  %v483_v31 = vrot.slane %v482_v23, 4  ;;  %vm4299_vm6 = vsmask.f32 7424 }
  0xa7   : > { %470 = vst [vmem:[#allocation2 + $0x20] sm:$0xc] %v469_v28  ;;  %v707_v26 = vld [vmem:[#allocation2] sm:$0xf] }
  0xa8   : > { %v462_v32 = vld [vmem:[#allocation2 + $0x1c] sm:$0xc]  ;;  %v490_v25 = vsel %vm3087_vm9, %v483_v31, %v489_v27  ;;  %v3244_v27 = vld [vmem:[#allocation2 + $0x4] sm:$0xf]  ;;  %vm4294_vm9 = vmmov 0  }
  0xa9   : > { %v346_v33 = vld [vmem:[#allocation2 + $0x8] sm:$0xc]  ;;  %v463_v34 = vsel %vm345_vm0, %v3111_v43, %v462_v32  ;;  %491 = vst [vmem:[#allocation2 + $0x24] sm:$0xf] %v490_v25  ;;  %v851_v43 = vld [vmem:[#allocation2 + $0x4] sm:$0xe]  ;;  %2748 = vmatprep.mubr.msk.bf16.mxu0 %vm4294_vm9, %v3000_v0  ;;  %2770 = vmatprep.mubr.msk.bf16.mxu1 %vm4294_vm9, %v3000_v0 }
  0xaa   : > { %v378_v35 = vld [vmem:[#allocation2 + $0xc] sm:$0x8]  ;;  %v347_v36 = vsel %vm345_vm0, %v3091_v18, %v346_v33  ;;  %464 = vst [vmem:[#allocation2 + $0x1c] sm:$0xc] %v463_v34  ;;  %v3185_v45 = vld [vmem:[#allocation2 + $0x10] sm:$0xf] }
  0xab   : > { %v379_v37 = vsel %vm3134_vm12, %v3074_v1, %v378_v35  ;;  %348 = vst [vmem:[#allocation2 + $0x8] sm:$0xc] %v347_v36  ;;  %v3253_v36 = vcombine.low %v707_v26, %v3244_v27 }
  0xac   : > { %v518_v38 = vld [vmem:[#allocation2 + $0x2c] sm:$0x3]  ;;  %380 = vst [vmem:[#allocation2 + $0xc] sm:$0x8] %v379_v37 }
  0xad   : > { %v519_v39 = vsel %vm3154_vm8, 0, %v518_v38  ;;  %v438_v15 = vld [vmem:[#allocation2 + $0x18] sm:$0xe] }
  0xae   : > { %520 = vst [vmem:[#allocation2 + $0x2c] sm:$0x3] %v519_v39  ;;  %v439_v40 = vsel %vm3081_vm4, %v3076_v9, %v438_v15  ;;  %v486_v41 = vld [vmem:[#allocation2 + $0x20] sm:$0x8]  ;;  %v2956_v39 = vld [vmem:[%s4286_s1 + $0x4] sm:$0xfc]  }
  0xaf   : > { %440 = vst [vmem:[#allocation2 + $0x18] sm:$0xe] %v439_v40  ;;  %v487_v18 = vsel %vm3134_vm12, %v478_v5, %v486_v41  ;;  %v852_v5 = vld [vmem:[#allocation2 + $0x28] sm:$0xf]  ;;  %v3259_v15 = vld [vmem:[#allocation2 + $0x10] sm:$0xff]  }
  0xb0   : > { %488 = vst [vmem:[#allocation2 + $0x20] sm:$0x8] %v487_v18  ;;  %v492_v42 = vld [vmem:[#allocation2 + $0x24] sm:$0x8] }
  0xb1   : > { %v493_v1 = vsel %vm3134_vm12, 0, %v492_v42  ;;  %v3206_v29 = vld [vmem:[#allocation2 + $0x1c] sm:$0xf]  ;;  %vm4298_vm12 = vcmask 1046528  }
  0xb2   : > { %494 = vst [vmem:[#allocation2 + $0x24] sm:$0x8] %v493_v1  ;;  %v3187_v46 = vld [vmem:[#allocation2 + $0x8] sm:$0xf] }
  0xb3   : > { %v3183_v44 = vld [vmem:[#allocation2 + $0xc] sm:$0xf]  ;;  %v3196_v47 = vcombine.low %v851_v43, %v3187_v46  ;;  %v2603_v59 = vcombine.low %v855_v52, %v3187_v46  ;;  %v1190_v38 = vld [vmem:[#allocation2 + $0x8] sm:$0xc]  ;;  %v1242_v52 = vshll.u32 %v3259_v15, 16 }
  0xb4   : > { %v3193_v9 = vcombine.low %v3183_v44, %v3185_v45  ;;  %v1191_v37 = vld [vmem:[#allocation2 + $0xc] sm:$0xf]  ;;  %v3263_v40 = vcombine.low %v3187_v46, %v3183_v44  ;;  %v1005_v44 = vrot.slane %v2956_v39, 2 }
  0xb5   : > { %v521_v48 = vld [vmem:[#allocation2 + $0x2c] sm:$0xe]  ;;  %v874_v54 = vshll.u32 %v3196_v47, 16  ;;  %v872_v57 = vshrl.u32 %v3196_v47, 16  ;;  %v933_v8 = vrot.slane %v2603_v59, 1  ;;  %v3266_v1 = vcombine.low %v1190_v38, %v1191_v37 }
  0xb6   : > { %v522_v49 = vsel %vm3081_vm4, 0, %v521_v48  ;;  %v879_v51 = vshll.u32 %v3193_v9, 16  ;;  %v3203_v53 = vld [vmem:[#allocation2 + $0x18] sm:$0xf]  ;;  %v883_v11 = vshrl.u32 %v3193_v9, 16  ;;  %v934_v7 = vrot.slane %v3193_v9, 1 }
  0xb7   : > { %523 = vst [vmem:[#allocation2 + $0x2c] sm:$0xe] %v522_v49  ;;  %v3210_v30 = vcombine.low %v3200_v50, %v3203_v53  ;;  %v3213_v56 = vld [vmem:[#allocation2 + $0x20] sm:$0xf]  ;;  %v876_v58 = vrot.slane %v874_v54, 1  ;;  %v3271_v49 = vld [vmem:[#allocation2 + $0x18] sm:$0xff]  }
  0xb8   : > { %v881_v55 = vrot.slane %v879_v51, 1  ;;  %v3219_v60 = vcombine.low %v3206_v29, %v3213_v56  ;;  %v935_v17 = vsel %vm4298_vm12, %v933_v8, %v934_v7  ;;  %v3237_v21 = vld [vmem:[#allocation2 + $0x2c] ss:$0 sps:$4 sm:$0x33]   ;;  %v751_v51 = vshll.u32 %v3253_v36, 16 }
  0xb9   : > { %v887_v62 = vshll.u32 %v3210_v30, 16  ;;  %v877_v63 = vor.u32 %v876_v58, %v872_v57  ;;  %v3223_v4 = vld [vmem:[#allocation2 + $0x24] sm:$0xf]  ;;  %v936_v12 = vrot.slane %v3210_v30, 1  ;;  %v891_v13 = vshrl.u32 %v3210_v30, 16 }
  0xba   : > { %v885_v61 = vor.u32 %v883_v11, %v881_v55  ;;  %v895_v3 = vshll.u32 %v3219_v60, 16  ;;  %v3233_v14 = vcombine.low %v3223_v4, %v852_v5  ;;  %v938_v23 = vrot.slane %v3219_v60, 1 }
  0xbb   : > { %v889_v2 = vrot.slane %v887_v62, 1  ;;  %v882_v6 = vsel %vm4299_vm6, %v877_v63, %v881_v55  ;;  %v937_v22 = vsel %vm4298_vm12, %v934_v7, %v936_v12  ;;  %v899_v24 = vshrl.u32 %v3219_v60, 16  ;;  %v2959_v63 = vld [vmem:[%s4286_s1] sm:$0x3f]  }
  0xbc   : > { %918 = vrot.lane.b32.xlu1 %v882_v6, %s3001_s25  ;;  %v897_v16 = vrot.slane %v895_v3, 1  ;;  %v903_v20 = vshll.u32 %v3233_v14, 16  ;;  %v907_v25 = vshrl.u32 %v3233_v14, 16  ;;  %v911_v33 = vshll.u32 %v3237_v21, 16 }
  0xbd   : > { %v890_v10 = vsel %vm4299_vm6, %v885_v61, %v889_v2  ;;  %v893_v19 = vor.u32 %v891_v13, %v889_v2  ;;  %v939_v34 = vsel %vm4298_vm12, %v936_v12, %v938_v23  ;;  %v940_v35 = vrot.slane %v3233_v14, 1  ;;  %v1202_v61 = vld [vmem:[#allocation2 + $0x8] sm:$0x8] }
  0xbe   : > { %920 = vrot.lane.b32.xlu0 %v890_v10, %s3001_s25  ;;  %v901_v28 = vor.u32 %v899_v24, %v897_v16  ;;  %v905_v32 = vrot.slane %v903_v20, 1  ;;  %v913_v42 = vrot.slane %v911_v33, 1  ;;  %v942_v48 = vrot.slane %v3237_v21, 1 }
  0xbf   : > { %v898_v31 = vsel %vm4299_vm6, %v893_v19, %v897_v16  ;;  %v941_v43 = vsel %vm4298_vm12, %v938_v23, %v940_v35  ;;  %v915_v46 = vshrl.u32 %v3237_v21, 16  ;;  %v756_v55 = vshll.u32 %v3263_v40, 16  ;;  %v3301_v23 = vld [vmem:[#allocation2 + $0x20] sm:$0xff]  }
  0xc0   : > { %944 = vrot.lane.b32.xlu1 %v935_v17, %s3002_s26  ;;  %v906_v41 = vsel %vm4299_vm6, %v901_v28, %v905_v32  ;;  %v909_v18 = vor.u32 %v907_v25, %v905_v32  ;;  %v1237_v11 = vshll.u32 %v3266_v1, 16  ;;  %v943_v57 = vsel %vm4298_vm12, %v940_v35, %v942_v48 }
  0xc1   : > { %v1250_v58 = vshll.u32 %v3271_v49, 16  ;;  %v753_v59 = vrot.slane %v751_v51, 1  ;;  %vm4293_vm4 = vcmask 1045504   ;;  %v917_v2 = vor.u32 %v915_v46, %v913_v42 }
  0xc2   : > { %946 = vrot.lane.b32.xlu0 %v937_v22, %s3002_s26  ;;  %v914_v54 = vsel %vm4299_vm6, %v909_v18, %v913_v42  ;;  %v1024_v62 = vsel %vm4293_vm4, %v1005_v44, 0  ;;  %v1244_v3 = vrot.slane %v1242_v52, 1  ;;  %v749_v5 = vshrl.u32 %v3253_v36, 16  ;;  %v718_v22 = vld [vmem:[#allocation2] sm:$0xe]  ;;  %v3323_v42 = vld [vmem:[#allocation2 + $0x28] sm:$0xff]  }
  0xc3   : > { %2747 = vmatpush3.bf16.msra.mxu0 %v1024_v62  ;;  %v758_v6 = vrot.slane %v756_v55, 1  ;;  %v1239_v7 = vrot.slane %v1237_v11, 1  ;;  %v1115_v8 = vsel %vm4293_vm4, %v2959_v63, 0  ;;  %v1246_v10 = vshrl.u32 %v3259_v15, 16 }
  0xc4   : > { %922 = vrot.lane.b32.xlu1 %v898_v31, %s3001_s25  ;;  %2790 = vmatprep.subr.bf16.mxu0 %v3000_v0  ;;  %v1252_v12 = vrot.slane %v1250_v58, 1  ;;  %v2623_v13 = vcombine.low %v1202_v61, %v1191_v37  ;;  %v754_v16 = vor.u32 %v753_v59, %v749_v5  ;;  %v1235_v17 = vshrl.u32 %v3266_v1, 16  ;;  %v2954_v59 = vld [vmem:[#allocation2 + $0x30] ss:$0 sps:$4 sm:$0x77]  }
  0xc5   : > { %2769 = vmatpush3.bf16.msra.mxu1 %v1115_v8  ;;  %v1248_v19 = vor.u32 %v1246_v10, %v1244_v3  ;;  %v1297_v28 = vrot.slane %v3259_v15, 1  ;;  %v2595_v31 = vcombine.low %v718_v22, %v3244_v27  ;;  %v3310_v32 = vcombine.low %v3185_v45, %v3200_v50 }
  0xc6   : > { %948 = vrot.lane.b32.xlu0 %v939_v34, %s3002_s26  ;;  %2812 = vmatprep.subr.bf16.mxu1 %v3000_v0  ;;  %v759_v20 = vsel %vm4299_vm6, %v754_v16, %v758_v6  ;;  %v1240_v21 = vor.u32 %v1239_v7, %v1235_v17  ;;  %v1296_v26 = vrot.slane %v2623_v13, 1  ;;  %v1299_v33 = vrot.slane %v3271_v49, 1 }
  0xc7   : > { %v1253_v24 = vsel %vm4299_vm6, %v1248_v19, %v1252_v12  ;;  %v1258_v34 = vshll.u32 %v3301_v23, 16  ;;  %v807_v37 = vrot.slane %v3263_v40, 1  ;;  %v1254_v27 = vshrl.u32 %v3271_v49, 16 }
  0xc8   : > { %924 = vrot.lane.b32.xlu1 %v906_v41, %s3001_s25  ;;  %v1245_v25 = vsel %vm4299_vm6, %v1240_v21, %v1244_v3  ;;  %v1298_v35 = vsel %vm4298_vm12, %v1296_v26, %v1297_v28  ;;  %v806_v38 = vrot.slane %v2595_v31, 1  ;;  %v760_v45 = vshrl.u32 %v3263_v40, 16 }
  0xc9   : > { %v764_v50 = vshll.u32 %v3310_v32, 16  ;;  %v1300_v39 = vsel %vm4298_vm12, %v1297_v28, %v1299_v33  ;;  %v1256_v41 = vor.u32 %v1254_v27, %v1252_v12  ;;  %v1260_v18 = vrot.slane %v1258_v34, 1 }
  0xca   : > { %950 = vrot.lane.b32.xlu0 %v941_v43, %s3002_s26  ;;  %v808_v43 = vsel %vm4298_vm12, %v806_v38, %v807_v37  ;;  %v3329_v51 = vcombine.low %v3203_v53, %v3206_v29  ;;  %v1301_v52 = vrot.slane %v3301_v23, 1  ;;  %v809_v53 = vrot.slane %v3310_v32, 1 }
  0xcb   : > { %v766_v44 = vrot.slane %v764_v50, 1  ;;  %v1261_v46 = vsel %vm4299_vm6, %v1256_v41, %v1260_v18  ;;  %v768_v62 = vshrl.u32 %v3310_v32, 16  ;;  %v1303_v7 = vrot.slane %v3323_v42, 1 }
  0xcc   : > { %926 = vrot.lane.b32.xlu1 %v914_v54, %s3001_s25  ;;  %v1266_v54 = vshll.u32 %v3323_v42, 16  ;;  %v772_v11 = vshll.u32 %v3329_v51, 16  ;;  %v1302_v29 = vsel %vm4298_vm12, %v1299_v33, %v1301_v52  ;;  %v810_v61 = vsel %vm4298_vm12, %v807_v37, %v809_v53 }
  0xcd   : > { %v770_v5 = vor.u32 %v768_v62, %v766_v44  ;;  %v1270_v8 = vshrl.u32 %v3323_v42, 16  ;;  %v1274_v10 = vshll.u32 %v2954_v59, 16  ;;  %v811_v13 = vrot.slane %v3329_v51, 1 }
  0xce   : > { %952 = vrot.lane.b32.xlu0 %v943_v57, %s3002_s26  ;;  %v1262_v57 = vshrl.u32 %v3301_v23, 16  ;;  %v1268_v58 = vrot.slane %v1266_v54, 1  ;;  %v774_v63 = vrot.slane %v772_v11, 1  ;;  %v1304_v16 = vsel %vm4298_vm12, %v1301_v52, %v1303_v7  ;;  %v2957_v52 = vld [vmem:[%s4286_s1 + $0xc] sm:$0x3f]  }
  0xcf   : > { %v1276_v19 = vrot.slane %v1274_v10, 1  ;;  %v1305_v28 = vrot.slane %v2954_v59, 1  ;;  %v1278_v34 = vshrl.u32 %v2954_v59, 16  ;;  %v1385_v59 = vsel %vm4293_vm4, %v2957_v52, 0 }
  0xd0   : > { %928 = vrot.lane.b32.xlu1 %v917_v2, %s3001_s25  ;;  %v3347_v2 = vcombine.low %v3213_v56, %v3223_v4  ;;  %v1264_v3 = vor.u32 %v1262_v57, %v1260_v18  ;;  %v775_v12 = vsel %vm4299_vm6, %v770_v5, %v774_v63  ;;  %v776_v4 = vshrl.u32 %v3329_v51, 16 }
  0xd1   : > { %v1272_v17 = vor.u32 %v1270_v8, %v1268_v58  ;;  %v1306_v37 = vsel %vm4298_vm12, %v1303_v7, %v1305_v28  ;;  %v1280_v50 = vor.u32 %v1278_v34, %v1276_v19 }
  0xd2   : > { %954 = vrot.lane.b32.xlu0 %v942_v48, %s3002_s26  ;;  %v762_v48 = vor.u32 %v760_v45, %v758_v6  ;;  %v1269_v6 = vsel %vm4299_vm6, %v1264_v3, %v1268_v58  ;;  %v780_v56 = vshll.u32 %v3347_v2, 16  ;;  %v778_v21 = vor.u32 %v776_v4, %v774_v63 }
  0xd3   : > { %v1277_v26 = vsel %vm4299_vm6, %v1272_v17, %v1276_v19 }
  0xd4   : > { %792 = vrot.lane.b32.xlu1 %v759_v20, %s3001_s25  ;;  %v767_v55 = vsel %vm4299_vm6, %v762_v48, %v766_v44  ;;  %v812_v20 = vsel %vm4298_vm12, %v809_v53, %v811_v13  ;;  %v782_v22 = vrot.slane %v780_v56, 1 }
  0xd6   : > { %1283 = vrot.lane.b32.xlu0 %v1253_v24, %s3001_s25  ;;  %v2955_v24 = vld [vmem:[#allocation2 + $0x28] ss:$0 sps:$4 sm:$0x11]   ;;  %v783_v31 = vsel %vm4299_vm6, %v778_v21, %v782_v22 }
  0xd7   : > { %v788_v33 = vshll.u32 %v2955_v24, 16  ;;  %v815_v41 = vrot.slane %v2955_v24, 1 }
  0xd8   : > { %1281 = vrot.lane.b32.xlu1 %v1245_v25, %s3001_s25  ;;  %v813_v25 = vrot.slane %v3347_v2, 1 }
  0xd9   : > { %v790_v45 = vrot.slane %v788_v33, 1 }
  0xda   : > { %1307 = vrot.lane.b32.xlu0 %v1298_v35, %s3002_s26  ;;  %v784_v35 = vshrl.u32 %v3347_v2, 16  ;;  %v814_v27 = vsel %vm4298_vm12, %v811_v13, %v813_v25  ;;  %v816_v18 = vsel %vm4298_vm12, %v813_v25, %v815_v41 }
  0xdc   : > { %1309 = vrot.lane.b32.xlu1 %v1300_v39, %s3002_s26  ;;  %v786_v38 = vor.u32 %v784_v35, %v782_v22  ;;  %v2958_v22 = vld [vmem:[#allocation2 + $0x2c] ss:$0 sps:$4 sm:$0x11]  }
  0xde   : > { %817 = vrot.lane.b32.xlu0 %v808_v43, %s3002_s26  ;;  %v791_v39 = vsel %vm4299_vm6, %v786_v38, %v790_v45  ;;  %vm4363_vm6 = vcmask 60416  }
  0xe0   : > { %1285 = vrot.lane.b32.xlu1 %v1261_v46, %s3001_s25 }
  0xe2   : > { %794 = vrot.lane.b32.xlu0 %v767_v55, %s3001_s25 }
  0xe4   : > { %1311 = vrot.lane.b32.xlu1 %v1302_v29, %s3002_s26 }
  0xe6   : > { %819 = vrot.lane.b32.xlu0 %v810_v61, %s3002_s26 }
  0xe8   : > { %1287 = vrot.lane.b32.xlu1 %v1269_v6, %s3001_s25 }
  0xea   : > { %796 = vrot.lane.b32.xlu0 %v775_v12, %s3001_s25 }
  0xec   : > { %1313 = vrot.lane.b32.xlu1 %v1304_v16, %s3002_s26 }
  0xee   : > { %821 = vrot.lane.b32.xlu0 %v812_v20, %s3002_s26 }
  0xf0   : > { %1289 = vrot.lane.b32.xlu1 %v1277_v26, %s3001_s25 }
  0xf2   : > { %798 = vrot.lane.b32.xlu0 %v783_v31, %s3001_s25 }
  0xf4   : > { %1315 = vrot.lane.b32.xlu1 %v1306_v37, %s3002_s26 }
  0xf6   : > { %823 = vrot.lane.b32.xlu0 %v814_v27, %s3002_s26 }
  0xf8   : > { %1291 = vrot.lane.b32.xlu1 %v1280_v50, %s3001_s25 }
  0xfa   : > { %800 = vrot.lane.b32.xlu0 %v791_v39, %s3001_s25 }
  0xfc   : > { %1317 = vrot.lane.b32.xlu1 %v1305_v28, %s3002_s26 }
  0xfe   : > { %825 = vrot.lane.b32.xlu0 %v816_v18, %s3002_s26 }
 0x12e   : > { %v919_v43 = vpop.permute.xlu1 %918 }
 0x12f   : > { %v957_v44 = vsel %vm827_vm11, %v3196_v47, %v919_v43 }
 0x130   : > { %v921_v48 = vpop.permute.xlu0 %920 }
 0x131   : > { %v959_v54 = vsel %vm827_vm11, %v3193_v9, %v921_v48 }
 0x132   : > { %v945_v46 = vpop.permute.xlu1 %944 }
 0x133   : > { %v970_v11 = vsel %vm4296_vm7, %v957_v44, %v945_v46 }
 0x134   : > { %v947_v55 = vpop.permute.xlu0 %946  ;;  %v989_v29 = vrot.slane %v970_v11, 1 }
 0x135   : > { %v972_v53 = vsel %vm4296_vm7, %v959_v54, %v947_v55 }
 0x136   : > { %v990_v57 = vrot.slane %v972_v53, 1  ;;  %v923_v58 = vpop.permute.xlu1 %922 }
 0x137   : > { %v961_v61 = vsel %vm827_vm11, %v3210_v30, %v923_v58 }
 0x138   : > { %v949_v47 = vpop.permute.xlu0 %948  ;;  %v991_v62 = vsel %vm4298_vm12, %v989_v29, %v990_v57 }
 0x139   : > { %v974_v63 = vsel %vm4296_vm7, %v961_v61, %v949_v47  ;;  %2749 = vmatmul.mubr.msk.bf16.vlgmr.msra.gmra.mrb[0].mxu0 %vm1006_vm10, %v991_v62 }
 0x13a   : > { %2791 = vmatpush3.bf16.msra.mxu0 %v1385_v59  ;;  %2752 = vmatprep.mubr.msk.bf16.mxu0 %vm4294_vm9, %v3000_v0  ;;  %v925_v9 = vpop.permute.xlu1 %924  ;;  %v992_v3 = vrot.slane %v974_v63, 1 }
 0x13b   : > { %2836 = vmatprep.subr.bf16.mxu0 %v3000_v0  ;;  %v963_v6 = vsel %vm827_vm11, %v3219_v60, %v925_v9 }
 0x13c   : > { %v951_v5 = vpop.permute.xlu0 %950  ;;  %v993_v8 = vsel %vm4298_vm12, %v990_v57, %v992_v3 }
 0x13d   : > { %v976_v10 = vsel %vm4296_vm7, %v963_v6, %v951_v5 }
 0x13e   : > { %v927_v7 = vpop.permute.xlu1 %926  ;;  %v994_v13 = vrot.slane %v976_v10, 1 }
 0x13f   : > { %v965_v4 = vsel %vm827_vm11, %v3233_v14, %v927_v7 }
 0x140   : > { %v953_v30 = vpop.permute.xlu0 %952  ;;  %v995_v60 = vsel %vm4298_vm12, %v992_v3, %v994_v13 }
 0x141   : > { %2753 = vmatmul.mubr.msk.bf16.gmra.mrb[4].mxu0 %vm1006_vm10, %v993_v8  ;;  %v978_v19 = vsel %vm4296_vm7, %v965_v4, %v953_v30 }
 0x142   : > { %2756 = vmatprep.mubr.msk.bf16.mxu0 %vm4294_vm9, %v3000_v0  ;;  %v929_v12 = vpop.permute.xlu1 %928  ;;  %v996_v21 = vrot.slane %v978_v19, 1  ;;  %v1531_v19 = vld [vmem:[#allocation3 + $0x4] sm:$0x3] }
 0x143   : > { %v968_v26 = vsel %vm827_vm11, %v2958_v22, %v929_v12  ;;  %v2960_v12 = vld [vmem:[#allocation2 + $0x30] ss:$0 sps:$4 sm:$0x33]  }
 0x144   : > { %v955_v56 = vpop.permute.xlu0 %954  ;;  %v997_v25 = vsel %vm4298_vm12, %v994_v13, %v996_v21 }
 0x145   : > { %v980_v33 = vsel %vm4296_vm7, %v968_v26, %v955_v56 }
 0x146   : > { %v793_v16 = vpop.permute.xlu1 %792  ;;  %v998_v37 = vrot.slane %v980_v33, 1 }
 0x147   : > { %v829_v14 = vsel %vm827_vm11, %v3253_v36, %v793_v16 }
 0x148   : > { %v1284_v17 = vpop.permute.xlu0 %1283  ;;  %v999_v41 = vsel %vm4298_vm12, %v996_v21, %v998_v37 }
 0x149   : > { %2757 = vmatmul.mubr.msk.bf16.gmra.mrb[8].mxu0 %vm1006_vm10, %v995_v60  ;;  %v1322_v38 = vsel %vm827_vm11, %v3259_v15, %v1284_v17 }
 0x14a   : > { %2760 = vmatprep.mubr.msk.bf16.mxu0 %vm4294_vm9, %v3000_v0  ;;  %v1282_v20 = vpop.permute.xlu1 %1281 }
 0x14b   : > { %v1320_v45 = vsel %vm827_vm11, %v3266_v1, %v1282_v20  ;;  %v1532_v20 = vsel %vm3489_vm13, 0, %v1531_v19 }
 0x14c   : > { %v1308_v24 = vpop.permute.xlu0 %1307  ;;  %1533 = vst [vmem:[#allocation3 + $0x4] sm:$0x3] %v1532_v20 }
 0x14d   : > { %v1333_v15 = vsel %vm4296_vm7, %v1320_v45, %v1308_v24  ;;  %v526_v24 = vlaneseq }
 0x14e   : > { %v1310_v28 = vpop.permute.xlu1 %1309  ;;  %v1353_v44 = vrot.slane %v1333_v15, 2 }
 0x14f   : > { %v1335_v18 = vsel %vm4296_vm7, %v1322_v38, %v1310_v28 }
 0x150   : > { %v818_v31 = vpop.permute.xlu0 %817 }
 0x151   : > { %v840_v34 = vsel %vm4296_vm7, %v829_v14, %v818_v31  ;;  %2761 = vmatmul.mubr.msk.bf16.gmra.mrb[12].mxu0 %vm1006_vm10, %v997_v25  ;;  %v3495_v14 = vshrl.u32 %v526_v24, 7 }
 0x152   : > { %2771 = vmatmul.mubr.msk.bf16.vlgmr.msra.gmra.mrb[0].mxu1 %vm1006_vm10, %v840_v34  ;;  %2764 = vmatprep.mubr.msk.bf16.mxu0 %vm4294_vm9, %v3000_v0  ;;  %v1286_v35 = vpop.permute.xlu1 %1285 }
 0x153   : > { %2774 = vmatprep.mubr.msk.bf16.mxu1 %vm4294_vm9, %v3000_v0  ;;  %v1324_v54 = vsel %vm827_vm11, %v3271_v49, %v1286_v35  ;;  %v528_v33 = vadd.s32 8, %v3495_v14  ;;  %v3503_v35 = vmul.u32.u64.low 3435973837, %v3495_v14  ;;  %v3504_v37 = vmul.u32.u64.high 3435973837, %v3495_v14, %v3503_v35 }
 0x154   : > { %v795_v36 = vpop.permute.xlu0 %794  ;;  %v530_v38 = vadd.s32 24, %v3495_v14  ;;  %v3518_v15 = vadd.s32 32, %v3495_v14 }
 0x155   : > { %v831_v50 = vsel %vm827_vm11, %v3263_v40, %v795_v36  ;;  %v1354_v40 = vrot.slane %v1335_v18, 2  ;;  %v529_v36 = vadd.s32 16, %v3495_v14 }
 0x156   : > { %v1312_v27 = vpop.permute.xlu1 %1311 }
 0x157   : > { %v1355_v52 = vsel %vm4293_vm4, %v1353_v44, %v1354_v40  ;;  %v1337_v53 = vsel %vm4296_vm7, %v1324_v54, %v1312_v27 }
 0x158   : > { %v820_v39 = vpop.permute.xlu0 %819  ;;  %v1356_v57 = vrot.slane %v1337_v53, 2 }
 0x159   : > { %v842_v43 = vsel %vm4296_vm7, %v831_v50, %v820_v39  ;;  %2765 = vmatmul.mubr.msk.bf16.gmra.mrb[16].mxu0 %vm1006_vm10, %v999_v41  ;;  %v3508_v45 = vmul.u32.u64.low 3435973837, %v528_v33  ;;  %v3509_v50 = vmul.u32.u64.high 3435973837, %v528_v33, %v3508_v45 }
 0x15a   : > { %2775 = vmatmul.mubr.msk.bf16.gmra.mrb[4].mxu1 %vm1006_vm10, %v842_v43  ;;  %2792 = vmatprep.mubr.msk.bf16.mxu0 %vm4294_vm9, %v3000_v0  ;;  %v1288_v1 = vpop.permute.xlu1 %1287  ;;  %v1357_v61 = vsel %vm4293_vm4, %v1354_v40, %v1356_v57  ;;  %v3511_v39 = vmul.u32.u64.low 3435973837, %v529_v36  ;;  %v3512_v41 = vmul.u32.u64.high 3435973837, %v529_v36, %v3511_v39  ;;  %v3523_v40 = vadd.s32 40, %v3495_v14 }
 0x15b   : > { %2778 = vmatprep.mubr.msk.bf16.mxu1 %vm4294_vm9, %v3000_v0  ;;  %v3514_v18 = vmul.u32.u64.low 3435973837, %v530_v38  ;;  %v3515_v43 = vmul.u32.u64.high 3435973837, %v530_v38, %v3514_v18 }
 0x15c   : > { %v797_v48 = vpop.permute.xlu0 %796 }
 0x15d   : > { %v833_v55 = vsel %vm827_vm11, %v3310_v32, %v797_v48  ;;  %v1326_v32 = vsel %vm827_vm11, %v3301_v23, %v1288_v1 }
 0x15e   : > { %v1314_v46 = vpop.permute.xlu1 %1313 }
 0x15f   : > { %v1339_v62 = vsel %vm4296_vm7, %v1326_v32, %v1314_v46  ;;  %v543_v46 = vshrl.u32 %v3504_v37, 3  ;;  %v3540_v32 = vadd.s32 48, %v3495_v14 }
 0x160   : > { %v822_v11 = vpop.permute.xlu0 %821  ;;  %v1358_v23 = vrot.slane %v1339_v62, 2 }
 0x161   : > { %v844_v29 = vsel %vm4296_vm7, %v833_v55, %v822_v11  ;;  %2793 = vmatmul.mubr.msk.bf16.vlgmr.msra.gmra.mrb[20].mxu0 %vm1006_vm10, %v1355_v52  ;;  %v3529_v54 = vmul.u32.u64.low 3435973837, %v3518_v15  ;;  %v3530_v55 = vmul.u32.u64.high 3435973837, %v3518_v15, %v3529_v54 }
 0x162   : > { %2779 = vmatmul.mubr.msk.bf16.gmra.mrb[8].mxu1 %vm1006_vm10, %v844_v29  ;;  %2796 = vmatprep.mubr.msk.bf16.mxu0 %vm4294_vm9, %v3000_v0  ;;  %v1290_v58 = vpop.permute.xlu1 %1289  ;;  %v1359_v30 = vsel %vm4293_vm4, %v1356_v57, %v1358_v23  ;;  %v3533_v11 = vmul.u32.u64.low 3435973837, %v3523_v40  ;;  %v3534_v53 = vmul.u32.u64.high 3435973837, %v3523_v40, %v3533_v11  ;;  %v554_v29 = vshrl.u32 %v3509_v50, 3 }
 0x163   : > { %2782 = vmatprep.mubr.msk.bf16.mxu1 %vm4294_vm9, %v3000_v0  ;;  %v1328_v3 = vsel %vm827_vm11, %v3323_v42, %v1290_v58  ;;  %v544_v57 = vmul.u32 10, %v543_v46  ;;  %v576_v58 = vshrl.u32 %v3515_v43, 3  ;;  %v3634_v54 = vadd.s32 72, %v3495_v14 }
 0x164   : > { %v799_v49 = vpop.permute.xlu0 %798 }
 0x165   : > { %v835_v59 = vsel %vm827_vm11, %v3329_v51, %v799_v49  ;;  %v565_v49 = vshrl.u32 %v3512_v41, 3 }
 0x166   : > { %v1316_v9 = vpop.permute.xlu1 %1315 }
 0x167   : > { %v1341_v8 = vsel %vm4296_vm7, %v1328_v3, %v1316_v9  ;;  %v3552_v3 = vsub.s32 %v3495_v14, %v544_v57 }
 0x168   : > { %v824_v47 = vpop.permute.xlu0 %823  ;;  %v1360_v42 = vrot.slane %v1341_v8, 2  ;;  %v587_v8 = vshrl.u32 %v3530_v55, 3 }
 0x169   : > { %v846_v63 = vsel %vm4296_vm7, %v835_v59, %v824_v47  ;;  %2797 = vmatmul.mubr.msk.bf16.gmra.mrb[24].mxu0 %vm1006_vm10, %v1357_v61  ;;  %v3545_v47 = vadd.s32 56, %v3495_v14  ;;  %vm647_vm5 = vcmp.ne.s32.totalorder %v3552_v3, 0  ;;  %vm657_vm14 = vcmp.lt.s32.totalorder %v3552_v3, 0 }
 0x16a   : > { %2783 = vmatmul.mubr.msk.bf16.gmra.mrb[12].mxu1 %vm1006_vm10, %v846_v63  ;;  %2800 = vmatprep.mubr.msk.bf16.mxu0 %vm4294_vm9, %v3000_v0  ;;  %v1292_v6 = vpop.permute.xlu1 %1291  ;;  %v1361_v56 = vsel %vm4293_vm4, %v1358_v23, %v1360_v42  ;;  %v555_v63 = vmul.u32 10, %v554_v29  ;;  %v588_v20 = vmul.u32 10, %v587_v8 }
 0x16b   : > { %2786 = vmatprep.mubr.msk.bf16.mxu1 %vm4294_vm9, %v3000_v0 }
 0x16c   : > { %v801_v51 = vpop.permute.xlu0 %800 }
 0x16d   : > { %v837_v5 = vsel %vm827_vm11, %v3347_v2, %v801_v51  ;;  %v1331_v2 = vsel %vm827_vm11, %v2960_v12, %v1292_v6  ;;  %vm3598_vm11 = vmand %vm657_vm14, %vm647_vm5  ;;  %vm4297_vm14 = vcmask 1043456  }
 0x16e   : > { %v1318_v13 = vpop.permute.xlu1 %1317 }
 0x16f   : > { %v1343_v4 = vsel %vm4296_vm7, %v1331_v2, %v1318_v13  ;;  %v598_v13 = vshrl.u32 %v3534_v53, 3 }
 0x170   : > { %v826_v7 = vpop.permute.xlu0 %825  ;;  %v1362_v16 = vrot.slane %v1343_v4, 2 }
 0x171   : > { %v848_v10 = vsel %vm4296_vm7, %v837_v5, %v826_v7  ;;  %2801 = vmatmul.mubr.msk.bf16.gmra.mrb[28].mxu0 %vm1006_vm10, %v1359_v30  ;;  %v566_v5 = vmul.u32 10, %v565_v49  ;;  %v577_v30 = vmul.u32 10, %v576_v58 }
 0x172   : > { %2787 = vmatmul.mubr.msk.bf16.gmra.mrb[16].mxu1 %vm1006_vm10, %v848_v10  ;;  %2804 = vmatprep.mubr.msk.bf16.mxu0 %vm4294_vm9, %v3000_v0  ;;  %v1363_v17 = vsel %vm4293_vm4, %v1360_v42, %v1362_v16  ;;  %v3556_v10 = vmul.u32.u64.low 3435973837, %v3540_v32  ;;  %v3557_v12 = vmul.u32.u64.high 3435973837, %v3540_v32, %v3556_v10  ;;  %v3566_v16 = vsub.s32 %v528_v33, %v555_v63 }
 0x173   : > { %2816 = vmatprep.mubr.msk.bf16.mxu1 %vm4294_vm9, %v3000_v0  ;;  %v3570_v19 = vsub.s32 %v530_v38, %v577_v30 }
 0x174   : > { %vm648_vm15 = vcmp.ne.s32.totalorder %v3566_v16, 0  ;;  %vm658_vm8 = vcmp.lt.s32.totalorder %v3566_v16, 0  ;;  %v609_v50 = vshrl.u32 %v3557_v12, 3 }
 0x175   : > { %vm660_vm2 = vcmp.lt.s32.totalorder %v3570_v19, 0  ;;  %vm3615_vm5 = vmand %vm658_vm8, %vm648_vm15  ;;  %v680_v11 = vadd.s32 10, %v3570_v19 }
 0x176   : > { %v610_v49 = vmul.u32 10, %v609_v50 }
 0x179   : > { %2805 = vmatmul.mubr.msk.bf16.gmra.mrb[32].mxu0 %vm1006_vm10, %v1361_v56  ;;  %v3563_v56 = vmul.u32.u64.low 3435973837, %v3545_v47  ;;  %v3564_v4 = vmul.u32.u64.high 3435973837, %v3545_v47, %v3563_v56 }
 0x17a   : > { %2808 = vmatprep.mubr.msk.bf16.mxu0 %vm4294_vm9, %v3000_v0 }
 0x181   : > { %2809 = vmatmul.mubr.msk.bf16.gmra.mrb[36].mxu0 %vm1006_vm10, %v1363_v17  ;;  %v3568_v17 = vsub.s32 %v529_v36, %v566_v5  ;;  %v3590_v36 = vadd.s32 10, %v3566_v16  ;;  %vm650_vm10 = vcmp.ne.s32.totalorder %v3570_v19, 0 }
 0x182   : > { %2840 = vmatprep.mubr.msk.bf16.mxu0 %vm4294_vm9, %v3000_v0  ;;  %vm3663_vm8 = vmand %vm660_vm2, %vm650_vm10 }
 0x183   : > { %vm649_vm3 = vcmp.ne.s32.totalorder %v3568_v17, 0  ;;  %vm659_vm0 = vcmp.lt.s32.totalorder %v3568_v17, 0  ;;  %v679_v55 = vadd.s32 10, %v3568_v17  ;;  %v688_v29 = vsel %vm3615_vm5, %v3590_v36, %v3566_v16 }
 0x184   : > { %vm3640_vm15 = vmand %vm659_vm0, %vm649_vm3  ;;  %vm1564_vm5 = vsmask.f32 5392 }
 0x185   : > { %v689_v10 = vsel %vm3640_vm15, %v679_v55, %v3568_v17  ;;  %v3700_v17 = vsub.s32 %v3540_v32, %v610_v49 }
 0x186   : > { %vm3727_vm4 = vcmp.lt.s32.totalorder %v689_v10, 8 }
 0x187   : > { %vm663_vm9 = vcmp.lt.s32.totalorder %v3700_v17, 0 }
 0x20c   : > { %v1060_v21 = vpop.f32.mrb[0].mxu0 }
 0x20d   : > { %v2750_v22 = vpop.f32.mrb[1].mxu0 }
 0x20e   : > { %v1063_v26 = vpop.f32.mrb[2].mxu0  ;;  %v599_v22 = vmul.u32 10, %v598_v13 }
 0x20f   : > { %v2751_v28 = vpop.f32.mrb[3].mxu0 }
 0x210   : > { %v3577_v28 = vadd.s32 10, %v3552_v3  ;;  %v3620_v43 = vsub.s32 %v3523_v40, %v599_v22 }
 0x212   : > { %v687_v53 = vsel %vm3598_vm11, %v3577_v28, %v3552_v3  ;;  %vm652_vm11 = vcmp.ne.s32.totalorder %v3620_v43, 0  ;;  %vm662_vm10 = vcmp.lt.s32.totalorder %v3620_v43, 0  ;;  %v682_v16 = vadd.s32 10, %v3620_v43 }
 0x213   : > { %vm3703_vm15 = vcmp.lt.s32.totalorder %v687_v53, 8 }
 0x214   : > { %v3497_v31 = vpop.f32.mrb[4].mxu0 }
 0x215   : > { %v2754_v25 = vpop.f32.mrb[5].mxu0 }
 0x216   : > { %v3500_v34 = vpop.f32.mrb[6].mxu0  ;;  %v3582_v25 = vadd.s32 64, %v3495_v14  ;;  %v3653_v14 = vld [vmem:[%s4287_s2] ss:$0 sm:$0xff] }
 0x217   : > { %v2755_v27 = vpop.f32.mrb[7].mxu0 }
 0x21c   : > { %v3520_v1 = vpop.f32.mrb[8].mxu0 }
 0x21d   : > { %v2758_v48 = vpop.f32.mrb[9].mxu0 }
 0x21e   : > { %v3525_v44 = vpop.f32.mrb[10].mxu0  ;;  %v2982_v48 = vld [vmem:[%s4288_s3 + $0xc] sm:$0xff]  }
 0x21f   : > { %v2759_v52 = vpop.f32.mrb[11].mxu0  ;;  %2813 = vmatpush3.bf16.msra.mxu1 %v2982_v48 }
 0x220   : > { %v3630_v46 = vmul.u32.u64.low 3435973837, %v3582_v25  ;;  %v3631_v52 = vmul.u32.u64.high 3435973837, %v3582_v25, %v3630_v46  ;;  %2814 = vmatprep.subr.bf16.mxu1 %v3000_v0 }
 0x222   : > { %v631_v28 = vshrl.u32 %v3631_v52, 3 }
 0x224   : > { %v3542_v59 = vpop.f32.mrb[12].mxu0 }
 0x225   : > { %v2762_v61 = vpop.f32.mrb[13].mxu0  ;;  %v1151_v62 = vpop.f32.mrb[0].mxu1 }
 0x226   : > { %v3547_v9 = vadd.f32 %v1151_v62, %v1060_v21  ;;  %v3549_v23 = vpop.f32.mrb[14].mxu0  ;;  %v2772_v51 = vpop.f32.mrb[1].mxu1 }
 0x227   : > { %v2763_v6 = vpop.f32.mrb[15].mxu0  ;;  %v1154_v7 = vpop.f32.mrb[2].mxu1 }
 0x228   : > { %v3559_v42 = vadd.f32 %v1154_v7, %v1063_v26  ;;  %v2773_v2 = vpop.f32.mrb[3].mxu1  ;;  %v3675_v5 = vmul.u32.u64.low 3435973837, %v3634_v54  ;;  %v3676_v6 = vmul.u32.u64.high 3435973837, %v3634_v54, %v3675_v5 }
 0x22c   : > { %v3572_v21 = vpop.f32.mrb[16].mxu0 }
 0x22d   : > { %v2766_v24 = vpop.f32.mrb[17].mxu0  ;;  %v1159_v26 = vpop.f32.mrb[4].mxu1 }
 0x22e   : > { %v3585_v33 = vadd.f32 %v1159_v26, %v3497_v31  ;;  %v3587_v35 = vpop.f32.mrb[18].mxu0  ;;  %v2776_v37 = vpop.f32.mrb[5].mxu1  ;;  %v3605_v31 = vsub.s32 %v3518_v15, %v588_v20  ;;  %v620_v15 = vshrl.u32 %v3564_v4, 3 }
 0x22f   : > { %v2767_v27 = vpop.f32.mrb[19].mxu0  ;;  %v1162_v38 = vpop.f32.mrb[6].mxu1 }
 0x230   : > { %v3609_v39 = vadd.f32 %v1162_v38, %v3500_v34  ;;  %v2777_v41 = vpop.f32.mrb[7].mxu1  ;;  %v2983_v34 = vld [vmem:[%s4288_s3 + $0x14] ss:$0 sps:$4 sm:$0xff]   ;;  %vm651_vm3 = vcmp.ne.s32.totalorder %v3605_v31, 0  ;;  %vm661_vm0 = vcmp.lt.s32.totalorder %v3605_v31, 0  ;;  %v621_v62 = vmul.u32 10, %v620_v15 }
 0x231   : > { %v2017_v58 = vsel %vm4297_vm14, %v2983_v34, 0  ;;  %v681_v12 = vadd.s32 10, %v3605_v31  ;;  %vm3694_vm2 = vmand %vm661_vm0, %vm651_vm3  ;;  %vm1676_vm3 = vcmask 60417   ;;  %vm3723_vm0 = vcmp.lt.s32.totalorder %v688_v29, 8 }
 0x232   : > { %2815 = vmatpush3.bf16.msra.mxu1 %v2017_v58  ;;  %v3719_v32 = vsub.s32 %v3545_v47, %v621_v62  ;;  %v632_v34 = vmul.u32 10, %v631_v28 }
 0x233   : > { %2860 = vmatprep.subr.bf16.mxu1 %v3000_v0  ;;  %v691_v47 = vsel %vm3694_vm2, %v681_v12, %v3605_v31 }
 0x234   : > { %v1421_v61 = vpop.f32.mrb[20].mxu0  ;;  %vm654_vm7 = vcmp.ne.s32.totalorder %v3719_v32, 0  ;;  %vm664_vm14 = vcmp.lt.s32.totalorder %v3719_v32, 0 }
 0x235   : > { %v1460_v63 = vadd.f32 %v1421_v61, %v3547_v9  ;;  %v1167_v51 = vpop.f32.mrb[8].mxu1  ;;  %v2794_v3 = vpop.f32.mrb[21].mxu0  ;;  %v690_v9 = vsel %vm3663_vm8, %v680_v11, %v3570_v19  ;;  %vm3714_vm8 = vmand %vm662_vm10, %vm652_vm11  ;;  %vm653_vm10 = vcmp.ne.s32.totalorder %v3700_v17, 0  ;;  %v3765_v61 = vadd.s32 10, %v3700_v17 }
 0x236   : > { %v3679_v7 = vadd.f32 %v1167_v51, %v3520_v1  ;;  %v2780_v30 = vpop.f32.mrb[9].mxu1  ;;  %v1424_v8 = vpop.f32.mrb[22].mxu0  ;;  %vm3731_vm11 = vcmp.lt.s32.totalorder %v690_v9, 8  ;;  %v692_v45 = vsel %vm3714_vm8, %v682_v16, %v3620_v43  ;;  %v642_v43 = vshrl.u32 %v3676_v6, 3  ;;  %vm3760_vm2 = vmand %vm663_vm9, %vm653_vm10 }
 0x237   : > { %v1477_v2 = vadd.f32 %v3653_v14, %v1460_v63  ;;  %v1461_v13 = vadd.f32 %v1424_v8, %v3559_v42  ;;  %v1170_v56 = vpop.f32.mrb[10].mxu1  ;;  %v2795_v1 = vpop.f32.mrb[23].mxu0  ;;  %vm3770_vm8 = vcmp.lt.s32.totalorder %v691_v47, 8  ;;  %vm3778_vm9 = vmand %vm664_vm14, %vm654_vm7  ;;  %vm4351_vm10 = vsmask.f32 7942 }
 0x238   : > { %v3708_v19 = vadd.f32 %v1170_v56, %v3525_v44  ;;  %v2781_v20 = vpop.f32.mrb[11].mxu1  ;;  %vm3784_vm12 = vmand %vm1676_vm3, %vm4351_vm10  ;;  %v1678_v8 = vld [vmem:[#allocation3 + $0x4] sm:$0xe]  ;;  %vm3795_vm7 = vcmp.lt.s32.totalorder %v692_v45, 8  ;;  %v643_v16 = vmul.u32 10, %v642_v43  ;;  %vm4358_vm3 = vcmask 60416  }
 0x239   : > { %v1487_v24 = vmax.f32 %v1477_v2, 0.0  ;;  %v1478_v26 = vadd.f32 %v3653_v14, %v1461_v13  ;;  %v3793_v2 = vsub.s32 %v3582_v25, %v632_v34  ;;  %vm3801_vm14 = vmor %vm293_vm1, %vm1564_vm5  ;;  %v693_v25 = vsel %vm3760_vm2, %v3765_v61, %v3700_v17 }
 0x23a   : > { %v3825_v34 = vsub.s32 %v3634_v54, %v643_v16  ;;  %vm3844_vm10 = vcmp.lt.s32.totalorder %v693_v25, 8 }
 0x23b   : > { %v1517_v27 = vsel %vm3703_vm15, %v1487_v24, 0.0  ;;  %v1488_v38 = vmax.f32 %v1478_v26, 0.0  ;;  %vm655_vm1 = vcmp.ne.s32.totalorder %v3793_v2, 0  ;;  %vm665_vm5 = vcmp.lt.s32.totalorder %v3793_v2, 0 }
 0x23c   : > { %v2697_v50 = vpack.c.bf16 %v1517_v27, %v1517_v27  ;;  %v1429_v41 = vpop.f32.mrb[24].mxu0  ;;  %v685_v54 = vadd.s32 10, %v3793_v2  ;;  %vm656_vm2 = vcmp.ne.s32.totalorder %v3825_v34, 0 }
 0x23d   : > { %v1518_v31 = vsel %vm3723_vm0, %v1488_v38, 0.0  ;;  %v1462_v18 = vadd.f32 %v1429_v41, %v3585_v33  ;;  %v1175_v15 = vpop.f32.mrb[12].mxu1  ;;  %v2798_v48 = vpop.f32.mrb[25].mxu0 }
 0x23e   : > { %v1567_v46 = vshrl.u32 %v2697_v50, 16  ;;  %v1570_v52 = vshll.u32 %v2697_v50, 16  ;;  %v2698_v40 = vpack.c.bf16 %v1518_v31, %v1518_v31  ;;  %v3752_v55 = vadd.f32 %v1175_v15, %v3542_v59  ;;  %v2784_v11 = vpop.f32.mrb[13].mxu1  ;;  %v1432_v53 = vpop.f32.mrb[26].mxu0 }
 0x23f   : > { %v1479_v29 = vadd.f32 %v3653_v14, %v1462_v18  ;;  %v1463_v57 = vadd.f32 %v1432_v53, %v3609_v39  ;;  %v1178_v49 = vpop.f32.mrb[14].mxu1  ;;  %v2799_v58 = vpop.f32.mrb[27].mxu0  ;;  %v3768_v59 = vadd.s32 10, %v3719_v32 }
 0x240   : > { %v1569_v62 = vrot.slane %v1567_v46, 6  ;;  %v1572_v63 = vrot.slane %v1570_v52, 7  ;;  %v1576_v51 = vshrl.u32 %v2698_v40, 16  ;;  %v1579_v39 = vshll.u32 %v2698_v40, 16  ;;  %v2785_v3 = vpop.f32.mrb[15].mxu1 }
 0x241   : > { %v1489_v10 = vmax.f32 %v1479_v29, 0.0  ;;  %v1480_v9 = vadd.f32 %v3653_v14, %v1463_v57  ;;  %v3790_v12 = vadd.f32 %v1178_v49, %v3549_v23  ;;  %v694_v24 = vsel %vm3778_vm9, %v3768_v59, %v3719_v32 }
 0x242   : > { %v1573_v13 = vor.u32 %v1572_v63, %v1569_v62  ;;  %v1578_v56 = vrot.slane %v1576_v51, 6  ;;  %v1581_v1 = vrot.slane %v1579_v39, 7  ;;  %vm3861_vm9 = vcmp.lt.s32.totalorder %v694_v24, 8 }
 0x243   : > { %v1519_v23 = vsel %vm3727_vm4, %v1489_v10, 0.0  ;;  %v1490_v22 = vmax.f32 %v1480_v9, 0.0 }
 0x244   : > { %v1574_v26 = vrot.slane %v1573_v13, 4  ;;  %v1679_v28 = vsel %vm3784_vm12, %v1573_v13, %v1678_v8  ;;  %v1582_v47 = vor.u32 %v1581_v1, %v1578_v56  ;;  %v2699_v27 = vpack.c.bf16 %v1519_v23, %v1519_v23  ;;  %v1437_v38 = vpop.f32.mrb[28].mxu0 }
 0x245   : > { %1680 = vst [vmem:[#allocation3 + $0x4] sm:$0xe] %v1679_v28  ;;  %v1520_v45 = vsel %vm3731_vm11, %v1490_v22, 0.0  ;;  %v1464_v50 = vadd.f32 %v1437_v38, %v3679_v7  ;;  %v1183_v41 = vpop.f32.mrb[16].mxu1  ;;  %v2802_v17 = vpop.f32.mrb[29].mxu0  ;;  %v686_v23 = vadd.s32 10, %v3825_v34 }
 0x246   : > { %v1583_v32 = vsel %vm3801_vm14, %v1574_v26, %v1582_v47  ;;  %v1586_v31 = vshrl.u32 %v2699_v27, 16  ;;  %v1589_v18 = vshll.u32 %v2699_v27, 16  ;;  %v2788_v15 = vpop.f32.mrb[17].mxu1  ;;  %v1440_v48 = vpop.f32.mrb[30].mxu0  ;;  %v2700_v43 = vpack.c.bf16 %v1520_v45, %v1520_v45 }
 0x247   : > { %1681 = vst.msk [vmem:[#allocation3 + $0x8] sm:$0xf] %vm4358_vm3, %v1583_v32  ;;  %v1481_v7 = vadd.f32 %v3653_v14, %v1464_v50  ;;  %v3830_v46 = vadd.f32 %v1183_v41, %v3572_v21  ;;  %v1465_v52 = vadd.f32 %v1440_v48, %v3708_v19  ;;  %v1186_v40 = vpop.f32.mrb[18].mxu1  ;;  %v2803_v11 = vpop.f32.mrb[31].mxu0  ;;  %v1584_v62 = vrot.slane %v1582_v47, 4  ;;  %vm3852_vm3 = vmand %vm665_vm5, %vm655_vm1 }
 0x248   : > { %v1588_v53 = vrot.slane %v1586_v31, 6  ;;  %v1591_v29 = vrot.slane %v1589_v18, 7  ;;  %v3834_v57 = vadd.f32 %v1186_v40, %v3587_v35  ;;  %v2789_v49 = vpop.f32.mrb[19].mxu1  ;;  %v1596_v58 = vshrl.u32 %v2700_v43, 16 }
 0x249   : > { %v1599_v33 = vshll.u32 %v2700_v43, 16  ;;  %v1491_v61 = vmax.f32 %v1481_v7, 0.0  ;;  %v1482_v59 = vadd.f32 %v3653_v14, %v1465_v52  ;;  %v695_v41 = vsel %vm3852_vm3, %v685_v54, %v3793_v2 }
 0x24a   : > { %v1592_v21 = vor.u32 %v1591_v29, %v1588_v53  ;;  %v1598_v19 = vrot.slane %v1596_v58, 6  ;;  %vm4369_vm5 = vcmask 60416   ;;  %vm3898_vm3 = vcmp.lt.s32.totalorder %v695_v41, 8 }
 0x24b   : > { %v1601_v63 = vrot.slane %v1599_v33, 7  ;;  %v1521_v35 = vsel %vm3770_vm8, %v1491_v61, 0.0  ;;  %v1492_v51 = vmax.f32 %v1482_v59, 0.0 }
 0x24c   : > { %v1593_v39 = vsel %vm3801_vm14, %v1584_v62, %v1592_v21  ;;  %v1594_v3 = vrot.slane %v1592_v21, 4  ;;  %v2701_v6 = vpack.c.bf16 %v1521_v35, %v1521_v35  ;;  %v1445_v10 = vpop.f32.mrb[32].mxu0  ;;  %v1840_v15 = vld [vmem:[#allocation3 + $0x4] sm:$0xe]  ;;  %v4371_v62 = vmov 0 }
 0x24d   : > { %1682 = vst.msk [vmem:[#allocation3 + $0xc] sm:$0xf] %vm4363_vm6, %v1593_v39  ;;  %v1602_v13 = vor.u32 %v1601_v63, %v1598_v19  ;;  %v1522_v56 = vsel %vm3795_vm7, %v1492_v51, 0.0  ;;  %v1466_v1 = vadd.f32 %v1445_v10, %v3752_v55  ;;  %v2806_v16 = vpop.f32.mrb[33].mxu0  ;;  %vm4366_vm6 = vcmp.lt.s32.totalorder %v3825_v34, 0 }
 0x24e   : > { %v1606_v22 = vshrl.u32 %v2701_v6, 16  ;;  %v1609_v25 = vshll.u32 %v2701_v6, 16  ;;  %v2702_v26 = vpack.c.bf16 %v1522_v56, %v1522_v56  ;;  %v1448_v47 = vpop.f32.mrb[34].mxu0  ;;  %vm3869_vm1 = vmand %vm4366_vm6, %vm656_vm2  ;;  %v3873_v55 = vld [vmem:[#allocation3 + $0x8] sm:$0xf]  ;;  %v4372_v62 = vsel %vm3898_vm3, 4294967295, %v4371_v62 }
 0x24f   : > { %v1603_v38 = vsel %vm3801_vm14, %v1594_v3, %v1602_v13  ;;  %v1483_v45 = vadd.f32 %v3653_v14, %v1466_v1  ;;  %v1467_v24 = vadd.f32 %v1448_v47, %v3790_v12  ;;  %v2807_v50 = vpop.f32.mrb[35].mxu0  ;;  %v696_v7 = vsel %vm3869_vm1, %v686_v23, %v3825_v34  ;;  %vm4370_vm2 = vmmov %vm4369_vm5  ;;  %v1844_v35 = vld [vmem:[#allocation3 + $0x4] sm:$0xc] }
 0x250   : > { %1683 = vst.msk [vmem:[#allocation3 + $0x10] sm:$0xf] %vm4369_vm5, %v1603_v38  ;;  %v1608_v17 = vrot.slane %v1606_v22, 6  ;;  %v1611_v32 = vrot.slane %v1609_v25, 7  ;;  %v1616_v31 = vshrl.u32 %v2702_v26, 16  ;;  %v1619_v18 = vshll.u32 %v2702_v26, 16  ;;  %vm4375_vm1 = vmmov %vm4370_vm2 }
 0x251   : > { %v1493_v48 = vmax.f32 %v1483_v45, 0.0  ;;  %v1484_v43 = vadd.f32 %v3653_v14, %v1467_v24  ;;  %v3888_v12 = vcombine.low %v1840_v15, %v3873_v55  ;;  %v1604_v52 = vrot.slane %v1602_v13, 4  ;;  %vm4376_vm5 = vmmov %vm4375_vm1 }
 0x252   : > { %v1612_v40 = vor.u32 %v1611_v32, %v1608_v17  ;;  %v1618_v2 = vrot.slane %v1616_v31, 6  ;;  %v1621_v11 = vrot.slane %v1619_v18, 7  ;;  %vm3903_vm6 = vcmp.lt.s32.totalorder %v696_v7, 8 }
 0x253   : > { %v1523_v53 = vsel %vm3844_vm10, %v1493_v48, 0.0  ;;  %v1494_v29 = vmax.f32 %v1484_v43, 0.0  ;;  %v1863_v49 = vshll.u32 %v3888_v12, 16  ;;  %v4373_v63 = vmov 0 }
 0x254   : > { %v1613_v54 = vsel %vm3801_vm14, %v1604_v52, %v1612_v40  ;;  %v1614_v58 = vrot.slane %v1612_v40, 4  ;;  %v1622_v33 = vor.u32 %v1621_v11, %v1618_v2  ;;  %v2703_v61 = vpack.c.bf16 %v1523_v53, %v1523_v53  ;;  %v1453_v34 = vpop.f32.mrb[36].mxu0  ;;  %v3909_v10 = vld [vmem:[#allocation3 + $0xc] sm:$0xf] }
 0x255   : > { %1684 = vst.msk [vmem:[#allocation3 + $0x14] sm:$0xf] %vm4370_vm2, %v1613_v54  ;;  %v1524_v59 = vsel %vm3861_vm9, %v1494_v29, 0.0  ;;  %v1468_v21 = vadd.f32 %v1453_v34, %v3830_v46  ;;  %v2810_v19 = vpop.f32.mrb[37].mxu0  ;;  %v4374_v63 = vsel %vm3903_vm6, 4294967295, %v4373_v63  ;;  %v1865_v9 = vrot.slane %v1863_v49, 1 }
 0x256   : > { %v1623_v51 = vsel %vm3801_vm14, %v1614_v58, %v1622_v33  ;;  %v1626_v39 = vshrl.u32 %v2703_v61, 16  ;;  %v1629_v3 = vshll.u32 %v2703_v61, 16  ;;  %v1456_v6 = vpop.f32.mrb[38].mxu0  ;;  %v2704_v13 = vpack.c.bf16 %v1524_v59, %v1524_v59 }
 0x257   : > { %1685 = vst.msk [vmem:[#allocation3 + $0x18] sm:$0xf] %vm4375_vm1, %v1623_v51  ;;  %v1485_v46 = vadd.f32 %v3653_v14, %v1468_v21  ;;  %v1469_v56 = vadd.f32 %v1456_v6, %v3834_v57  ;;  %v2811_v1 = vpop.f32.mrb[39].mxu0  ;;  %v3914_v16 = vld [vmem:[#allocation3 + $0x10] sm:$0xf]  ;;  %v2655_v23 = vcombine.low %v1844_v35, %v3873_v55  ;;  %v1861_v47 = vshrl.u32 %v3888_v12, 16 }
 0x258   : > { %v1628_v22 = vrot.slane %v1626_v39, 6  ;;  %v1631_v25 = vrot.slane %v1629_v3, 7  ;;  %v3919_v26 = vcombine.low %v3909_v10, %v3914_v16  ;;  %v1636_v27 = vshrl.u32 %v2704_v13, 16  ;;  %v2984_v51 = vld [vmem:[%s4288_s3] sm:$0xff]  }
 0x259   : > { %v1639_v38 = vshll.u32 %v2704_v13, 16  ;;  %v1495_v45 = vmax.f32 %v1485_v46, 0.0  ;;  %v1486_v24 = vadd.f32 %v3653_v14, %v1469_v56  ;;  %v1624_v50 = vrot.slane %v1622_v33, 4  ;;  %2837 = vmatpush3.bf16.msra.mxu0 %v2984_v51  ;;  %v1698_v51 = vld [vmem:[#allocation3] sm:$0xf] }
 0x25a   : > { %v1632_v57 = vor.u32 %v1631_v25, %v1628_v22  ;;  %v1866_v41 = vor.u32 %v1865_v9, %v1861_v47  ;;  %v1868_v17 = vshll.u32 %v3919_v26, 16  ;;  %v1638_v32 = vrot.slane %v1636_v27, 6  ;;  %2838 = vmatprep.subr.bf16.mxu0 %v3000_v0  ;;  %v1690_v27 = vld [vmem:[#allocation3 + $0x2c] sm:$0x3] }
 0x25b   : > { %v1641_v31 = vrot.slane %v1639_v38, 7  ;;  %v1525_v18 = vsel %vm3898_vm3, %v1495_v45, 0.0  ;;  %v1496_v15 = vmax.f32 %v1486_v24, 0.0  ;;  %v1923_v2 = vrot.slane %v3919_v26, 1 }
 0x25c   : > { %v1633_v48 = vsel %vm3801_vm14, %v1624_v50, %v1632_v57  ;;  %v1634_v43 = vrot.slane %v1632_v57, 4  ;;  %v2705_v7 = vpack.c.bf16 %v1525_v18, %v1525_v18  ;;  %v1870_v52 = vrot.slane %v1868_v17, 1  ;;  %v3932_v11 = vld [vmem:[#allocation3 + $0x14] sm:$0xf] }
 0x25d   : > { %1686 = vst.msk [vmem:[#allocation3 + $0x1c] sm:$0xf] %vm4376_vm5, %v1633_v48  ;;  %v1642_v14 = vor.u32 %v1641_v31, %v1638_v32  ;;  %v1526_v40 = vsel %vm3903_vm6, %v1496_v15, 0.0  ;;  %vm4377_vm2 = vsmask.f32 7424  ;;  %v1922_v61 = vrot.slane %v2655_v23, 1 }
 0x25e   : > { %v1646_v53 = vshrl.u32 %v2705_v7, 16  ;;  %v1649_v29 = vshll.u32 %v2705_v7, 16  ;;  %v2706_v49 = vpack.c.bf16 %v1526_v40, %v1526_v40  ;;  %v1871_v54 = vsel %vm4377_vm2, %v1866_v41, %v1870_v52  ;;  %v3935_v58 = vld [vmem:[#allocation3 + $0x18] sm:$0xf]  ;;  %vm4379_vm2 = vmmov %vm4375_vm1  ;;  %v3995_v30 = vld [vmem:[#allocation3 + $0x10] sm:$0xff]  }
 0x25f   : > { %v1643_v33 = vsel %vm3801_vm14, %v1634_v43, %v1642_v14  ;;  %1907 = vrot.lane.b32.xlu1 %v1871_v54, %s3002_s26  ;;  %v3942_v34 = vcombine.low %v3932_v11, %v3935_v58  ;;  %vm4378_vm5 = vcmask 1046528   ;;  %v1872_v3 = vshrl.u32 %v3919_v26, 16 }
 0x260   : > { %1687 = vst.msk [vmem:[#allocation3 + $0x20] sm:$0xf] %vm4375_vm1, %v1643_v33  ;;  %v1648_v59 = vrot.slane %v1646_v53, 6  ;;  %v1651_v21 = vrot.slane %v1649_v29, 7  ;;  %v1656_v19 = vshrl.u32 %v2706_v49, 16  ;;  %v1659_v35 = vshll.u32 %v2706_v49, 16 }
 0x261   : > { %v1924_v39 = vsel %vm4378_vm5, %v1922_v61, %v1923_v2  ;;  %v1876_v6 = vshll.u32 %v3942_v34, 16  ;;  %v1644_v9 = vrot.slane %v1642_v14, 4  ;;  %v1874_v1 = vor.u32 %v1872_v3, %v1870_v52  ;;  %vm4381_vm5 = vmmov %vm4379_vm2 }
 0x262   : > { %v1652_v13 = vor.u32 %v1651_v21, %v1648_v59  ;;  %v1658_v46 = vrot.slane %v1656_v19, 6  ;;  %v1661_v56 = vrot.slane %v1659_v35, 7  ;;  %vm4380_vm1 = vsmask.f32 7424  ;;  %v2188_v19 = vld [vmem:[#allocation3 + $0xc] sm:$0xf] }
 0x263   : > { %1933 = vrot.lane.b32.xlu1 %v1924_v39, %s3004_s16  ;;  %v1878_v23 = vrot.slane %v1876_v6, 1  ;;  %v1925_v45 = vrot.slane %v3942_v34, 1  ;;  %v1880_v18 = vshrl.u32 %v3942_v34, 16  ;;  %v2187_v35 = vld [vmem:[#allocation3 + $0x8] sm:$0xc] }
 0x264   : > { %v1653_v22 = vsel %vm3801_vm14, %v1644_v9, %v1652_v13  ;;  %v1654_v25 = vrot.slane %v1652_v13, 4  ;;  %v1662_v47 = vor.u32 %v1661_v56, %v1658_v46  ;;  %v3962_v57 = vld [vmem:[#allocation3 + $0x1c] sm:$0xf]  ;;  %v3999_v3 = vcombine.low %v2187_v35, %v2188_v19  ;;  %v1699_v6 = vld [vmem:[#allocation3 + $0x4] sm:$0xf] }
 0x265   : > { %1688 = vst.msk [vmem:[#allocation3 + $0x24] sm:$0xf] %vm4379_vm2, %v1653_v22  ;;  %v1879_v38 = vsel %vm4380_vm1, %v1874_v1, %v1878_v23  ;;  %vm4382_vm2 = vcmask 1046528   ;;  %v1882_v48 = vor.u32 %v1880_v18, %v1878_v23  ;;  %v3997_v39 = vld [vmem:[#allocation3 + $0x18] sm:$0xff]   ;;  %v2986_v9 = vld [vmem:[%s4288_s3 + $0x8] ss:$0 sps:$4 sm:$0xff]  }
 0x266   : > { %v1663_v24 = vsel %vm3801_vm14, %v1654_v25, %v1662_v47  ;;  %v1664_v50 = vrot.slane %v1662_v47, 4  ;;  %1909 = vrot.lane.b32.xlu0 %v1879_v38, %s3002_s26  ;;  %v1926_v20 = vsel %vm4382_vm2, %v1923_v2, %v1925_v45  ;;  %vm4383_vm14 = vmmov %vm4382_vm2  ;;  %v2239_v23 = vshll.u32 %v3995_v30, 16 }
 0x267   : > { %1689 = vst.msk [vmem:[#allocation3 + $0x28] sm:$0xf] %vm4381_vm5, %v1663_v24  ;;  %v3964_v41 = vld [vmem:[#allocation3 + $0x20] sm:$0xf]  ;;  %v2247_v22 = vshll.u32 %v3997_v39, 16  ;;  %v2234_v25 = vshll.u32 %v3999_v3, 16  ;;  %v4008_v47 = vcombine.low %v1698_v51, %v1699_v6 }
 0x268   : > { %v1691_v17 = vsel %vm3489_vm13, %v1664_v50, %v1690_v27  ;;  %v3970_v32 = vcombine.low %v3962_v57, %v3964_v41  ;;  %vm4384_vm13 = vmmov %vm4380_vm1 }
 0x269   : > { %1692 = vst [vmem:[#allocation3 + $0x2c] sm:$0x3] %v1691_v17  ;;  %vm4385_vm1 = vmmov %vm4382_vm2  ;;  %vm4388_vm2 = vcmask 1043456   ;;  %v2241_v17 = vrot.slane %v2239_v23, 1  ;;  %v2236_v18 = vrot.slane %v2234_v25, 1  ;;  %v2296_v23 = vrot.slane %v3997_v39, 1 }
 0x26a   : > { %1935 = vrot.lane.b32.xlu0 %v1926_v20, %s3004_s16  ;;  %v1927_v31 = vrot.slane %v3970_v32, 1  ;;  %v1884_v15 = vshll.u32 %v3970_v32, 16  ;;  %v1888_v49 = vshrl.u32 %v3970_v32, 16  ;;  %vm4386_vm5 = vmmov %vm4384_vm13  ;;  %v2112_v24 = vsel %vm4388_vm2, %v2986_v9, 0 }
 0x26b   : > { %2839 = vmatpush3.bf16.msra.mxu0 %v2112_v24  ;;  %v4016_v20 = vcombine.low %v3873_v55, %v3909_v10 }
 0x26c   : > { %v1886_v43 = vrot.slane %v1884_v15, 1  ;;  %v1928_v60 = vsel %vm4383_vm14, %v1925_v45, %v1927_v31  ;;  %v3980_v52 = vld [vmem:[#allocation3 + $0x24] sm:$0xf]  ;;  %vm4389_vm14 = vmmov %vm4386_vm5  ;;  %v2243_v15 = vshrl.u32 %v3995_v30, 16 }
 0x26d   : > { %v1746_v55 = vshll.u32 %v4016_v20, 16  ;;  %v4034_v9 = vld [vmem:[#allocation3 + $0x20] sm:$0xff]   ;;  %v1750_v25 = vshrl.u32 %v4016_v20, 16 }
 0x26e   : > { %1937 = vrot.lane.b32.xlu0 %v1928_v60, %s3004_s16  ;;  %v1887_v7 = vsel %vm4384_vm13, %v1882_v48, %v1886_v43  ;;  %v1841_v14 = vld [vmem:[#allocation3 + $0x28] sm:$0xf]  ;;  %v1890_v61 = vor.u32 %v1888_v49, %v1886_v43  ;;  %v2249_v48 = vrot.slane %v2247_v22, 1  ;;  %v1741_v43 = vshll.u32 %v4008_v47, 16  ;;  %vm4390_vm13 = vmmov %vm4386_vm5 }
 0x26f   : > { %1911 = vrot.lane.b32.xlu1 %v1887_v7, %s3002_s26  ;;  %v3984_v40 = vcombine.low %v3980_v52, %v1841_v14  ;;  %v2232_v7 = vshrl.u32 %v3999_v3, 16  ;;  %v2199_v14 = vld [vmem:[#allocation3 + $0x8] sm:$0x8]  ;;  %v1748_v35 = vrot.slane %v1746_v55, 1 }
 0x270   : > { %v1693_v2 = vld [vmem:[#allocation3 + $0x2c] sm:$0xe]  ;;  %v2967_v13 = vld [vmem:[#allocation3 + $0x2c] ss:$0 sps:$4 sm:$0x33]  }
 0x271   : > { %v1694_v53 = vsel %vm3784_vm12, 0, %v1693_v2  ;;  %v1929_v29 = vrot.slane %v3984_v40, 1  ;;  %v1892_v54 = vshll.u32 %v3984_v40, 16  ;;  %v1931_v46 = vrot.slane %v2967_v13, 1  ;;  %vm4387_vm12 = vmmov %vm4385_vm1 }
 0x272   : > { %1695 = vst [vmem:[#allocation3 + $0x2c] sm:$0xe] %v1694_v53  ;;  %v1896_v56 = vshrl.u32 %v3984_v40, 16  ;;  %v1900_v1 = vshll.u32 %v2967_v13, 16  ;;  %v2245_v2 = vor.u32 %v2243_v15, %v2241_v17  ;;  %v2677_v53 = vcombine.low %v2199_v14, %v2188_v19 }
 0x273   : > { %v1930_v33 = vsel %vm4385_vm1, %v1927_v31, %v1929_v29  ;;  %v1894_v59 = vrot.slane %v1892_v54, 1  ;;  %v1932_v27 = vsel %vm4387_vm12, %v1929_v29, %v1931_v46  ;;  %v1904_v31 = vshrl.u32 %v2967_v13, 16  ;;  %v1709_v29 = vld [vmem:[#allocation3] sm:$0xe]  ;;  %vm4391_vm1 = vmmov %vm4386_vm5 }
 0x274   : > { %1939 = vrot.lane.b32.xlu0 %v1930_v33, %s3004_s16  ;;  %v1902_v45 = vrot.slane %v1900_v1, 1  ;;  %v2237_v10 = vor.u32 %v2236_v18, %v2232_v7  ;;  %v2250_v49 = vsel %vm4390_vm13, %v2245_v2, %v2249_v48  ;;  %v2294_v54 = vrot.slane %v3995_v30, 1  ;;  %vm4396_vm13 = vmmov %vm4391_vm1 }
 0x275   : > { %v1895_v21 = vsel %vm4386_vm5, %v1890_v61, %v1894_v59  ;;  %v1898_v38 = vor.u32 %v1896_v56, %v1894_v59  ;;  %v1743_v33 = vrot.slane %v1741_v43, 1  ;;  %v4029_v61 = vcombine.low %v3914_v16, %v3932_v11  ;;  %vm4392_vm5 = vmmov %vm4387_vm12 }
 0x276   : > { %1913 = vrot.lane.b32.xlu1 %v1895_v21, %s3002_s26  ;;  %v1906_v60 = vor.u32 %v1904_v31, %v1902_v45  ;;  %v1739_v59 = vshrl.u32 %v4008_v47, 16  ;;  %v2242_v21 = vsel %vm4391_vm1, %v2237_v10, %v2241_v17  ;;  %v2293_v19 = vrot.slane %v2677_v53, 1  ;;  %vm4393_vm12 = vmmov %vm4391_vm1 }
 0x277   : > { %v1903_v50 = vsel %vm4389_vm14, %v1898_v38, %v1902_v45  ;;  %v2647_v51 = vcombine.low %v1709_v29, %v1699_v6  ;;  %v1796_v56 = vrot.slane %v4016_v20, 1  ;;  %v1754_v16 = vshll.u32 %v4029_v61, 16  ;;  %vm4394_vm2 = vmmov %vm4392_vm5 }
 0x278   : > { %1941 = vrot.lane.b32.xlu0 %v1932_v27, %s3004_s16  ;;  %v2295_v13 = vsel %vm4392_vm5, %v2293_v19, %v2294_v54  ;;  %v2255_v6 = vshll.u32 %v4034_v9, 16  ;;  %v4049_v38 = vcombine.low %v3935_v58, %v3962_v57  ;;  %vm4395_vm14 = vmmov %vm4394_vm2  ;;  %v1752_v24 = vor.u32 %v1750_v25, %v1748_v35  ;;  %v2980_v19 = vld [vmem:[#allocation3 + $0x30] ss:$0 sps:$4 sm:$0x77]  }
 0x279   : > { %v1795_v1 = vrot.slane %v2647_v51, 1  ;;  %v1756_v27 = vrot.slane %v1754_v16, 1  ;;  %v2297_v45 = vsel %vm4395_vm14, %v2294_v54, %v2296_v23  ;;  %v4054_v31 = vld [vmem:[#allocation3 + $0x28] sm:$0xff]   ;;  %v1798_v43 = vrot.slane %v4029_v61, 1  ;;  %vm4397_vm5 = vmmov %vm4394_vm2 }
 0x27a   : > { %1915 = vrot.lane.b32.xlu1 %v1903_v50, %s3002_s26  ;;  %v2251_v50 = vshrl.u32 %v3997_v39, 16  ;;  %v2257_v17 = vrot.slane %v2255_v6, 1  ;;  %v1762_v58 = vshll.u32 %v4049_v38, 16  ;;  %v2263_v7 = vshll.u32 %v4054_v31, 16  ;;  %vm4400_vm14 = vmmov %vm4391_vm1 }
 0x27b   : > { %v1797_v22 = vsel %vm4394_vm2, %v1795_v1, %v1796_v56  ;;  %v1757_v18 = vsel %vm4396_vm13, %v1752_v24, %v1756_v27  ;;  %v1799_v14 = vsel %vm4397_vm5, %v1796_v56, %v1798_v43  ;;  %v1758_v2 = vshrl.u32 %v4029_v61, 16  ;;  %vm4401_vm13 = vmmov %vm4397_vm5  ;;  %v2981_v16 = vld [vmem:[#allocation3 + $0x28] ss:$0 sps:$4 sm:$0x11]  }
 0x27c   : > { %1943 = vrot.lane.b32.xlu0 %v1931_v46, %s3004_s16  ;;  %v1744_v46 = vor.u32 %v1743_v33, %v1739_v59  ;;  %v2253_v15 = vor.u32 %v2251_v50, %v2249_v48  ;;  %v1764_v53 = vrot.slane %v1762_v58, 1  ;;  %v4069_v48 = vcombine.low %v3964_v41, %v3980_v52 }
 0x27d   : > { %v1760_v10 = vor.u32 %v1758_v2, %v1756_v27  ;;  %v2259_v29 = vshrl.u32 %v4034_v9, 16  ;;  %v1800_v59 = vrot.slane %v4049_v38, 1  ;;  %v2300_v52 = vrot.slane %v4054_v31, 1 }
 0x27e   : > { %1917 = vrot.lane.b32.xlu1 %v1906_v60, %s3002_s26  ;;  %v1749_v11 = vsel %vm4393_vm12, %v1744_v46, %v1748_v35  ;;  %v2258_v57 = vsel %vm4391_vm1, %v2253_v15, %v2257_v17  ;;  %v2298_v60 = vrot.slane %v4034_v9, 1  ;;  %vm4398_vm12 = vmmov %vm4394_vm2  ;;  %v2271_v35 = vshll.u32 %v2980_v19, 16 }
 0x27f   : > { %vm4399_vm2 = vmmov %vm4391_vm1  ;;  %v2261_v33 = vor.u32 %v2259_v29, %v2257_v17  ;;  %v1801_v51 = vsel %vm4401_vm13, %v1798_v43, %v1800_v59  ;;  %v2267_v56 = vshrl.u32 %v4054_v31, 16  ;;  %v1802_v25 = vrot.slane %v4069_v48, 1 }
 0x280   : > { %2280 = vrot.lane.b32.xlu0 %v2250_v49, %s3002_s26  ;;  %v2299_v55 = vsel %vm4398_vm12, %v2296_v23, %v2298_v60  ;;  %v2265_v49 = vrot.slane %v2263_v7, 1  ;;  %v1765_v54 = vsel %vm4399_vm2, %v1760_v10, %v1764_v53  ;;  %vm4402_vm1 = vmmov %vm4397_vm5  ;;  %v2273_v6 = vrot.slane %v2271_v35, 1 }
 0x281   : > { %vm4403_vm5 = vmmov %vm4399_vm2  ;;  %v1778_v27 = vshll.u32 %v2981_v16, 16  ;;  %v2302_v24 = vrot.slane %v2980_v19, 1  ;;  %v1774_v50 = vshrl.u32 %v4069_v48, 16  ;;  %v2275_v17 = vshrl.u32 %v2980_v19, 16  ;;  %v2985_v19 = vld [vmem:[%s4288_s3 + $0x18] sm:$0xff]  }
 0x282   : > { %2278 = vrot.lane.b32.xlu1 %v2242_v21, %s3002_s26  ;;  %v1770_v21 = vshll.u32 %v4069_v48, 16  ;;  %v2266_v41 = vsel %vm4400_vm14, %v2261_v33, %v2265_v49  ;;  %v2269_v23 = vor.u32 %v2267_v56, %v2265_v49  ;;  %vm4404_vm12 = vmmov %vm4399_vm2  ;;  %v1804_v7 = vrot.slane %v2981_v16, 1 }
 0x283   : > { %vm4405_vm2 = vmmov %vm4402_vm1  ;;  %v1780_v43 = vrot.slane %v1778_v27, 1 }
 0x284   : > { %2304 = vrot.lane.b32.xlu0 %v2295_v13, %s3004_s16  ;;  %v1766_v13 = vshrl.u32 %v4049_v38, 16  ;;  %v1772_v46 = vrot.slane %v1770_v21, 1  ;;  %vm4406_vm14 = vmmov %vm4402_vm1 }
 0x285   : > { %v2303_v58 = vsel %vm4406_vm14, %v2300_v52, %v2302_v24  ;;  %vm4407_vm13 = vmmov %vm4403_vm5  ;;  %vm4300_vm14 = vcmask 195584  }
 0x286   : > { %1782 = vrot.lane.b32.xlu1 %v1749_v11, %s3002_s26  ;;  %v2301_v11 = vsel %vm4402_vm1, %v2298_v60, %v2300_v52  ;;  %v1768_v1 = vor.u32 %v1766_v13, %v1764_v53  ;;  %v1776_v15 = vor.u32 %v1774_v50, %v1772_v46  ;;  %v2988_v50 = vld [vmem:[#allocation3 + $0x2c] ss:$0 sps:$4 sm:$0x11]  }
 0x288   : > { %1806 = vrot.lane.b32.xlu0 %v1797_v22, %s3004_s16  ;;  %v1773_v22 = vsel %vm4403_vm5, %v1768_v1, %v1772_v46  ;;  %v1781_v60 = vsel %vm4407_vm13, %v1776_v15, %v1780_v43  ;;  %vm1826_vm5 = vcmask 130048   ;;  %vm4410_vm13 = vmmov %vm4402_vm1 }
 0x289   : > { %vm4416_vm6 = vmmov %vm4410_vm13 }
 0x28a   : > { %2306 = vrot.lane.b32.xlu1 %v2297_v45, %s3004_s16  ;;  %v2274_v45 = vsel %vm4404_vm12, %v2269_v23, %v2273_v6  ;;  %vm4408_vm12 = vcmask 64512  }
 0x28c   : > { %1784 = vrot.lane.b32.xlu0 %v1757_v18, %s3002_s26  ;;  %v1803_v18 = vsel %vm4405_vm2, %v1800_v59, %v1802_v25  ;;  %vm4409_vm2 = vmmov %vm4408_vm12 }
 0x28e   : > { %2282 = vrot.lane.b32.xlu1 %v2258_v57, %s3002_s26  ;;  %v2277_v57 = vor.u32 %v2275_v17, %v2273_v6 }
 0x290   : > { %1808 = vrot.lane.b32.xlu0 %v1799_v14, %s3004_s16  ;;  %v1805_v14 = vsel %vm4402_vm1, %v1802_v25, %v1804_v7  ;;  %vm4411_vm1 = vmmov %vm4409_vm2 }
 0x292   : > { %2308 = vrot.lane.b32.xlu1 %v2299_v55, %s3004_s16 }
 0x294   : > { %1786 = vrot.lane.b32.xlu0 %v1765_v54, %s3002_s26 }
 0x296   : > { %2284 = vrot.lane.b32.xlu1 %v2266_v41, %s3002_s26  ;;  %v2987_v41 = vld [vmem:[%s4288_s3 + $0x20] ss:$0 sps:$4 sm:$0xff]  }
 0x298   : > { %1810 = vrot.lane.b32.xlu0 %v1801_v51, %s3004_s16 }
 0x29a   : > { %2310 = vrot.lane.b32.xlu1 %v2301_v11, %s3004_s16 }
 0x29c   : > { %1788 = vrot.lane.b32.xlu0 %v1773_v22, %s3002_s26 }
 0x29e   : > { %2286 = vrot.lane.b32.xlu1 %v2274_v45, %s3002_s26 }
 0x2a0   : > { %1812 = vrot.lane.b32.xlu0 %v1803_v18, %s3004_s16 }
 0x2a2   : > { %2312 = vrot.lane.b32.xlu1 %v2303_v58, %s3004_s16 }
 0x2a4   : > { %1790 = vrot.lane.b32.xlu0 %v1781_v60, %s3002_s26 }
 0x2a6   : > { %2288 = vrot.lane.b32.xlu1 %v2277_v57, %s3002_s26 }
 0x2a8   : > { %1814 = vrot.lane.b32.xlu0 %v1805_v14, %s3004_s16 }
 0x2aa   : > { %2314 = vrot.lane.b32.xlu1 %v2302_v24, %s3004_s16 }
 0x2d1   : > { %v1908_v2 = vpop.permute.xlu1 %1907 }
 0x2d2   : > { %v1946_v10 = vsel %vm4408_vm12, %v3888_v12, %v1908_v2  ;;  %vm4412_vm12 = vmmov 0  }
 0x2d5   : > { %v1934_v53 = vpop.permute.xlu1 %1933 }
 0x2d6   : > { %v1959_v29 = vsel %vm1826_vm5, %v1946_v10, %v1934_v53 }
 0x2d7   : > { %v1979_v59 = vrot.slane %v1959_v29, 1 }
 0x2d8   : > { %v1910_v55 = vpop.permute.xlu0 %1909 }
 0x2d9   : > { %v1948_v49 = vsel %vm4409_vm2, %v3919_v26, %v1910_v55  ;;  %vm4413_vm2 = vcmask 1043456  }
 0x2da   : > { %v2386_v13 = vsel %vm4413_vm2, %v2987_v41, 0 }
 0x2dc   : > { %v1936_v54 = vpop.permute.xlu0 %1935 }
 0x2dd   : > { %v1961_v33 = vsel %vm1826_vm5, %v1948_v49, %v1936_v54 }
 0x2de   : > { %v1980_v21 = vrot.slane %v1961_v33, 1 }
 0x2e0   : > { %v1981_v12 = vsel %vm4410_vm13, %v1979_v59, %v1980_v21  ;;  %v1938_v52 = vpop.permute.xlu0 %1937 }
 0x2e1   : > { %v1912_v35 = vpop.permute.xlu1 %1911  ;;  %2817 = vmatmul.mubr.msk.bf16.vlgmr.msra.gmra.mrb[20].mxu1 %vm4300_vm14, %v1981_v12  ;;  %vm4414_vm14 = vmmov %vm4411_vm1 }
 0x2e2   : > { %v1950_v26 = vsel %vm4411_vm1, %v3942_v34, %v1912_v35  ;;  %2861 = vmatpush3.bf16.msra.mxu1 %v2985_v19  ;;  %2820 = vmatprep.mubr.msk.bf16.mxu1 %vm4412_vm12, %v3000_v0  ;;  %vm4415_vm1 = vcmask 195584  }
 0x2e3   : > { %v1963_v51 = vsel %vm1826_vm5, %v1950_v26, %v1938_v52  ;;  %2862 = vmatprep.subr.bf16.mxu1 %v3000_v0  ;;  %vm4417_vm2 = vmmov %vm4415_vm1 }
 0x2e4   : > { %v1982_v46 = vrot.slane %v1963_v51, 1 }
 0x2e6   : > { %2863 = vmatpush3.bf16.msra.mxu1 %v2386_v13  ;;  %v1983_v16 = vsel %vm4410_vm13, %v1980_v21, %v1982_v46  ;;  %v1940_v11 = vpop.permute.xlu0 %1939  ;;  %vm4418_vm13 = vmmov %vm4414_vm14 }
 0x2e8   : > { %v1914_v56 = vpop.permute.xlu1 %1913 }
 0x2e9   : > { %v1952_v1 = vsel %vm4414_vm14, %v3970_v32, %v1914_v56  ;;  %2821 = vmatmul.mubr.msk.bf16.gmra.mrb[24].mxu1 %vm4415_vm1, %v1983_v16  ;;  %vm4419_vm14 = vmmov %vm4418_vm13 }
 0x2ea   : > { %v1965_v34 = vsel %vm1826_vm5, %v1952_v1, %v1940_v11  ;;  %2824 = vmatprep.mubr.msk.bf16.mxu1 %vm4412_vm12, %v3000_v0  ;;  %v1942_v6 = vpop.permute.xlu0 %1941  ;;  %vm4420_vm1 = vmmov %vm4416_vm6 }
 0x2eb   : > { %v1984_v23 = vrot.slane %v1965_v34, 1 }
 0x2ec   : > { %v1916_v25 = vpop.permute.xlu1 %1915 }
 0x2ed   : > { %v1985_v22 = vsel %vm4416_vm6, %v1982_v46, %v1984_v23  ;;  %v1954_v32 = vsel %vm4418_vm13, %v3984_v40, %v1916_v25  ;;  %vm4421_vm6 = vmmov %vm4417_vm2 }
 0x2ee   : > { %v1967_v27 = vsel %vm1826_vm5, %v1954_v32, %v1942_v6  ;;  %v1944_v45 = vpop.permute.xlu0 %1943 }
 0x2ef   : > { %v1986_v24 = vrot.slane %v1967_v27, 1 }
 0x2f0   : > { %v1918_v17 = vpop.permute.xlu1 %1917 }
 0x2f1   : > { %2825 = vmatmul.mubr.msk.bf16.gmra.mrb[28].mxu1 %vm4417_vm2, %v1985_v22  ;;  %v1957_v18 = vsel %vm4419_vm14, %v2988_v50, %v1918_v17  ;;  %v1987_v15 = vsel %vm4420_vm1, %v1984_v23, %v1986_v24  ;;  %vm4422_vm2 = vmmov %vm4418_vm13  ;;  %v2989_v17 = vld [vmem:[#allocation3 + $0x30] ss:$0 sps:$4 sm:$0x33]  }
 0x2f2   : > { %2828 = vmatprep.mubr.msk.bf16.mxu1 %vm4412_vm12, %v3000_v0  ;;  %v2281_v43 = vpop.permute.xlu0 %2280  ;;  %v1969_v58 = vsel %vm1826_vm5, %v1957_v18, %v1944_v45  ;;  %vm4423_vm13 = vmmov %vm4422_vm2 }
 0x2f3   : > { %v1988_v40 = vrot.slane %v1969_v58, 1  ;;  %vm4424_vm14 = vmmov %vm4420_vm1 }
 0x2f4   : > { %v2279_v57 = vpop.permute.xlu1 %2278  ;;  %vm4425_vm1 = vmmov %vm4421_vm6 }
 0x2f5   : > { %v2317_v2 = vsel %vm4423_vm13, %v3999_v3, %v2279_v57  ;;  %v1989_v55 = vsel %vm4424_vm14, %v1986_v24, %v1988_v40  ;;  %vm4427_vm3 = vmmov %vm4425_vm1 }
 0x2f6   : > { %v2305_v60 = vpop.permute.xlu0 %2304 }
 0x2f8   : > { %v1783_v7 = vpop.permute.xlu1 %1782 }
 0x2f9   : > { %2829 = vmatmul.mubr.msk.bf16.gmra.mrb[32].mxu1 %vm4421_vm6, %v1987_v15  ;;  %v1817_v14 = vsel %vm4422_vm2, %v4008_v47, %v1783_v7  ;;  %vm4426_vm6 = vmmov %vm4422_vm2  ;;  %v2330_v47 = vsel %vm1826_vm5, %v2317_v2, %v2305_v60  ;;  %vm4428_vm2 = vcmask 1045504  }
 0x2fa   : > { %2832 = vmatprep.mubr.msk.bf16.mxu1 %vm4412_vm12, %v3000_v0  ;;  %v1807_v53 = vpop.permute.xlu0 %1806  ;;  %v2319_v29 = vsel %vm4426_vm6, %v3995_v30, %v2281_v43  ;;  %v2350_v59 = vrot.slane %v2330_v47, 2  ;;  %vm4429_vm13 = vmmov %vm4426_vm6 }
 0x2fb   : > { %v1828_v10 = vsel %vm1826_vm5, %v1817_v14, %v1807_v53  ;;  %vm4431_vm14 = vmmov %vm4426_vm6 }
 0x2fc   : > { %2841 = vmatmul.mubr.msk.bf16.vlgmr.msra.gmra.mrb[40].mxu0 %vm4427_vm3, %v1828_v10  ;;  %v2307_v49 = vpop.permute.xlu1 %2306  ;;  %vm4430_vm3 = vmmov %vm4425_vm1 }
 0x2fd   : > { %v2332_v3 = vsel %vm1826_vm5, %v2319_v29, %v2307_v49  ;;  %2844 = vmatprep.mubr.msk.bf16.mxu0 %vm4412_vm12, %v3000_v0 }
 0x2fe   : > { %v2351_v54 = vrot.slane %v2332_v3, 2  ;;  %v1785_v33 = vpop.permute.xlu0 %1784 }
 0x2ff   : > { %v1819_v30 = vsel %vm4429_vm13, %v4016_v20, %v1785_v33  ;;  %vm4432_vm13 = vmmov %vm4425_vm1 }
 0x300   : > { %v2283_v21 = vpop.permute.xlu1 %2282  ;;  %v2352_v19 = vsel %vm4428_vm2, %v2350_v59, %v2351_v54 }
 0x301   : > { %2833 = vmatmul.mubr.msk.bf16.gmra.mrb[36].mxu1 %vm4425_vm1, %v1989_v55  ;;  %v2321_v52 = vsel %vm4431_vm14, %v3997_v39, %v2283_v21  ;;  %vm4434_vm14 = vmmov %vm4425_vm1 }
 0x302   : > { %2864 = vmatprep.mubr.msk.bf16.mxu1 %vm4412_vm12, %v3000_v0  ;;  %v1809_v41 = vpop.permute.xlu0 %1808 }
 0x303   : > { %v1830_v12 = vsel %vm1826_vm5, %v1819_v30, %v1809_v41 }
 0x304   : > { %2845 = vmatmul.mubr.msk.bf16.gmra.mrb[44].mxu0 %vm4425_vm1, %v1830_v12  ;;  %v2309_v35 = vpop.permute.xlu1 %2308 }
 0x305   : > { %v2334_v26 = vsel %vm1826_vm5, %v2321_v52, %v2309_v35  ;;  %2848 = vmatprep.mubr.msk.bf16.mxu0 %vm4412_vm12, %v3000_v0 }
 0x306   : > { %v2353_v20 = vrot.slane %v2334_v26, 2  ;;  %v1787_v51 = vpop.permute.xlu0 %1786 }
 0x307   : > { %v1821_v46 = vsel %vm4426_vm6, %v4029_v61, %v1787_v51 }
 0x308   : > { %v2285_v13 = vpop.permute.xlu1 %2284  ;;  %v2354_v39 = vsel %vm4428_vm2, %v2351_v54, %v2353_v20 }
 0x309   : > { %2865 = vmatmul.mubr.msk.bf16.vlgmr.msra.gmra.mrb[40].mxu1 %vm4430_vm3, %v2352_v19  ;;  %vm4433_vm3 = vmmov %vm4426_vm6 }
 0x30a   : > { %2868 = vmatprep.mubr.msk.bf16.mxu1 %vm4412_vm12, %v3000_v0  ;;  %v1811_v56 = vpop.permute.xlu0 %1810  ;;  %v2323_v11 = vsel %vm4433_vm3, %v4034_v9, %v2285_v13  ;;  %vm4435_vm1 = vmmov %vm4433_vm3 }
 0x30b   : > { %v1832_v16 = vsel %vm1826_vm5, %v1821_v46, %v1811_v56  ;;  %vm4436_vm6 = vmmov %vm4428_vm2 }
 0x30c   : > { %2849 = vmatmul.mubr.msk.bf16.gmra.mrb[48].mxu0 %vm4434_vm14, %v1832_v16  ;;  %v2311_v1 = vpop.permute.xlu1 %2310  ;;  %vm4437_vm2 = vmmov %vm4432_vm13  ;;  %v4221_v16 = vld [vmem:[%s4289_s4] ss:$0 sm:$0xff] }
 0x30d   : > { %v2336_v34 = vsel %vm1826_vm5, %v2323_v11, %v2311_v1  ;;  %2852 = vmatprep.mubr.msk.bf16.mxu0 %vm4412_vm12, %v3000_v0  ;;  %vm4439_vm3 = vmmov %vm4437_vm2 }
 0x30e   : > { %v2355_v61 = vrot.slane %v2336_v34, 2  ;;  %v1789_v23 = vpop.permute.xlu0 %1788  ;;  %vm4440_vm14 = vmmov %vm4435_vm1 }
 0x30f   : > { %v1823_v22 = vsel %vm4435_vm1, %v4049_v38, %v1789_v23 }
 0x310   : > { %v2287_v6 = vpop.permute.xlu1 %2286  ;;  %v2356_v9 = vsel %vm4436_vm6, %v2353_v20, %v2355_v61 }
 0x311   : > { %2869 = vmatmul.mubr.msk.bf16.gmra.mrb[44].mxu1 %vm4432_vm13, %v2354_v39  ;;  %vm4438_vm13 = vmmov %vm4435_vm1 }
 0x312   : > { %2872 = vmatprep.mubr.msk.bf16.mxu1 %vm4412_vm12, %v3000_v0  ;;  %v1813_v25 = vpop.permute.xlu0 %1812  ;;  %v2325_v27 = vsel %vm4438_vm13, %v4054_v31, %v2287_v6  ;;  %vm4441_vm13 = vmmov %vm4437_vm2 }
 0x313   : > { %v1834_v32 = vsel %vm1826_vm5, %v1823_v22, %v1813_v25 }
 0x314   : > { %2853 = vmatmul.mubr.msk.bf16.gmra.mrb[52].mxu0 %vm4439_vm3, %v1834_v32  ;;  %v2313_v45 = vpop.permute.xlu1 %2312  ;;  %vm4442_vm3 = vmmov %vm4436_vm6 }
 0x315   : > { %v2338_v24 = vsel %vm1826_vm5, %v2325_v27, %v2313_v45  ;;  %2856 = vmatprep.mubr.msk.bf16.mxu0 %vm4412_vm12, %v3000_v0 }
 0x316   : > { %v2357_v38 = vrot.slane %v2338_v24, 2  ;;  %v1791_v50 = vpop.permute.xlu0 %1790 }
 0x317   : > { %v1825_v15 = vsel %vm4440_vm14, %v4069_v48, %v1791_v50  ;;  %vm4443_vm14 = vmmov %vm4437_vm2 }
 0x318   : > { %v2289_v18 = vpop.permute.xlu1 %2288  ;;  %v2358_v58 = vsel %vm4436_vm6, %v2355_v61, %v2357_v38 }
 0x319   : > { %2873 = vmatmul.mubr.msk.bf16.gmra.mrb[48].mxu1 %vm4437_vm2, %v2356_v9  ;;  %v2328_v31 = vsel %vm4435_vm1, %v2989_v17, %v2289_v18 }
 0x31a   : > { %2876 = vmatprep.mubr.msk.bf16.mxu1 %vm4412_vm12, %v3000_v0  ;;  %v1815_v43 = vpop.permute.xlu0 %1814 }
 0x31b   : > { %v1836_v57 = vsel %vm1826_vm5, %v1825_v15, %v1815_v43 }
 0x31c   : > { %2857 = vmatmul.mubr.msk.bf16.gmra.mrb[56].mxu0 %vm4441_vm13, %v1836_v57  ;;  %v2315_v40 = vpop.permute.xlu1 %2314 }
 0x31d   : > { %v2340_v60 = vsel %vm1826_vm5, %v2328_v31, %v2315_v40  ;;  %vm4444_vm5 = vmmov %vm4435_vm1 }
 0x31e   : > { %v2359_v7 = vrot.slane %v2340_v60, 2 }
 0x320   : > { %v2360_v48 = vsel %vm4442_vm3, %v2357_v38, %v2359_v7 }
 0x321   : > { %2877 = vmatmul.mubr.msk.bf16.gmra.mrb[52].mxu1 %vm4437_vm2, %v2358_v58 }
 0x322   : > { %2880 = vmatprep.mubr.msk.bf16.mxu1 %vm4412_vm12, %v3000_v0  ;;  %vm4445_vm12 = vmmov %vm4435_vm1 }
 0x329   : > { %2881 = vmatmul.mubr.msk.bf16.gmra.mrb[56].mxu1 %vm4443_vm14, %v2360_v48 }
 0x3b4   : > { %v2053_v14 = vpop.f32.mrb[20].mxu1 }
 0x3b5   : > { %v2818_v2 = vpop.f32.mrb[21].mxu1 }
 0x3b6   : > { %v2056_v53 = vpop.f32.mrb[22].mxu1 }
 0x3b7   : > { %v2819_v55 = vpop.f32.mrb[23].mxu1 }
 0x3bc   : > { %v2061_v10 = vpop.f32.mrb[24].mxu1 }
 0x3bd   : > { %v2822_v29 = vpop.f32.mrb[25].mxu1 }
 0x3be   : > { %v2064_v49 = vpop.f32.mrb[26].mxu1 }
 0x3bf   : > { %v2823_v47 = vpop.f32.mrb[27].mxu1 }
 0x3c4   : > { %v2069_v3 = vpop.f32.mrb[28].mxu1 }
 0x3c5   : > { %v2826_v54 = vpop.f32.mrb[29].mxu1 }
 0x3c6   : > { %v2072_v33 = vpop.f32.mrb[30].mxu1 }
 0x3c7   : > { %v2827_v59 = vpop.f32.mrb[31].mxu1 }
 0x3cc   : > { %v2077_v0 = vpop.f32.mrb[32].mxu1 }
 0x3cd   : > { %v2830_v21 = vpop.f32.mrb[33].mxu1 }
 0x3ce   : > { %v4212_v19 = vpop.f32.mrb[34].mxu1 }
 0x3cf   : > { %v2831_v30 = vpop.f32.mrb[35].mxu1  ;;  %v2148_v52 = vpop.f32.mrb[40].mxu0 }
 0x3d0   : > { %v2149_v26 = vadd.f32 %v2148_v52, %v2053_v14  ;;  %v2842_v20 = vpop.f32.mrb[41].mxu0 }
 0x3d1   : > { %v2151_v13 = vpop.f32.mrb[42].mxu0 }
 0x3d2   : > { %v2152_v46 = vadd.f32 %v2151_v13, %v2056_v53  ;;  %v2843_v56 = vpop.f32.mrb[43].mxu0 }
 0x3d4   : > { %v4214_v41 = vpop.f32.mrb[36].mxu1 }
 0x3d5   : > { %v2834_v12 = vpop.f32.mrb[37].mxu1 }
 0x3d6   : > { %v4216_v35 = vpop.f32.mrb[38].mxu1 }
 0x3d7   : > { %v2835_v51 = vpop.f32.mrb[39].mxu1  ;;  %v2156_v34 = vpop.f32.mrb[44].mxu0 }
 0x3d8   : > { %v2157_v61 = vadd.f32 %v2156_v34, %v2061_v10  ;;  %v2846_v6 = vpop.f32.mrb[45].mxu0 }
 0x3d9   : > { %v2159_v32 = vpop.f32.mrb[46].mxu0 }
 0x3da   : > { %v2160_v27 = vadd.f32 %v2159_v32, %v2064_v49  ;;  %v2847_v45 = vpop.f32.mrb[47].mxu0 }
 0x3dc   : > { %v2422_v39 = vpop.f32.mrb[40].mxu1 }
 0x3dd   : > { %v2461_v11 = vadd.f32 %v2422_v39, %v2149_v26  ;;  %v2866_v1 = vpop.f32.mrb[41].mxu1 }
 0x3de   : > { %v2425_v23 = vpop.f32.mrb[42].mxu1 }
 0x3df   : > { %v2478_v22 = vadd.f32 %v4221_v16, %v2461_v11  ;;  %v2462_v25 = vadd.f32 %v2425_v23, %v2152_v46  ;;  %v2867_v9 = vpop.f32.mrb[43].mxu1  ;;  %v2164_v58 = vpop.f32.mrb[48].mxu0 }
 0x3e0   : > { %v2165_v57 = vadd.f32 %v2164_v58, %v2069_v3  ;;  %v2850_v60 = vpop.f32.mrb[49].mxu0 }
 0x3e1   : > { %v2488_v24 = vmax.f32 %v2478_v22, 0.0  ;;  %v2479_v38 = vadd.f32 %v4221_v16, %v2462_v25  ;;  %v2167_v14 = vpop.f32.mrb[50].mxu0 }
 0x3e2   : > { %v2168_v2 = vadd.f32 %v2167_v14, %v2072_v33  ;;  %v2851_v53 = vpop.f32.mrb[51].mxu0 }
 0x3e3   : > { %v2498_v50 = vsel %vm3703_vm15, %v2488_v24, 0.0  ;;  %v2489_v17 = vmax.f32 %v2479_v38, 0.0  ;;  %vm4446_vm15 = vmmov %vm4435_vm1 }
 0x3e4   : > { %2508 = vst.msk [vmem:[%s4228_s30] sm:$0xff] %vm4444_vm5, %v2498_v50  ;;  %v2430_v18 = vpop.f32.mrb[44].mxu1 }
 0x3e5   : > { %v2499_v15 = vsel %vm3723_vm0, %v2489_v17, 0.0  ;;  %v2463_v31 = vadd.f32 %v2430_v18, %v2157_v61  ;;  %v2870_v43 = vpop.f32.mrb[45].mxu1  ;;  %vm4447_vm0 = vmmov %vm4435_vm1 }
 0x3e6   : > { %2509 = vst.msk [vmem:[%s4228_s30 + $0x8] sm:$0xff] %vm4445_vm12, %v2499_v15  ;;  %v2433_v40 = vpop.f32.mrb[46].mxu1  ;;  %vm4453_vm1 = vmmov %vm4447_vm0 }
 0x3e7   : > { %v2480_v7 = vadd.f32 %v4221_v16, %v2463_v31  ;;  %v2464_v42 = vadd.f32 %v2433_v40, %v2160_v27  ;;  %v2871_v48 = vpop.f32.mrb[47].mxu1  ;;  %v2172_v59 = vpop.f32.mrb[52].mxu0  ;;  %vm4455_vm6 = vmmov %vm4447_vm0 }
 0x3e8   : > { %v2173_v33 = vadd.f32 %v2172_v59, %v2077_v0  ;;  %v2854_v30 = vpop.f32.mrb[53].mxu0 }
 0x3e9   : > { %v2490_v55 = vmax.f32 %v2480_v7, 0.0  ;;  %v2481_v44 = vadd.f32 %v4221_v16, %v2464_v42  ;;  %v2175_v26 = vpop.f32.mrb[54].mxu0 }
 0x3ea   : > { %v2176_v20 = vadd.f32 %v2175_v26, %v4212_v19  ;;  %v2855_v51 = vpop.f32.mrb[55].mxu0 }
 0x3eb   : > { %v2500_v10 = vsel %vm3727_vm4, %v2490_v55, 0.0  ;;  %v2491_v29 = vmax.f32 %v2481_v44, 0.0  ;;  %vm4448_vm4 = vmmov %vm4447_vm0 }
 0x3ec   : > { %2510 = vst.msk [vmem:[%s4228_s30 + $0x10] sm:$0xff] %vm4446_vm15, %v2500_v10  ;;  %v2438_v49 = vpop.f32.mrb[48].mxu1 }
 0x3ed   : > { %v2501_v47 = vsel %vm3731_vm11, %v2491_v29, 0.0  ;;  %v2465_v3 = vadd.f32 %v2438_v49, %v2165_v57  ;;  %v2874_v54 = vpop.f32.mrb[49].mxu1  ;;  %vm4449_vm11 = vmmov %vm4447_vm0 }
 0x3ee   : > { %2511 = vst.msk [vmem:[%s4228_s30 + $0x18] sm:$0xff] %vm4447_vm0, %v2501_v47  ;;  %v2441_v21 = vpop.f32.mrb[50].mxu1 }
 0x3ef   : > { %v2482_v12 = vadd.f32 %v4221_v16, %v2465_v3  ;;  %v2466_v37 = vadd.f32 %v2441_v21, %v2168_v2  ;;  %v2875_v52 = vpop.f32.mrb[51].mxu1  ;;  %v2180_v34 = vpop.f32.mrb[56].mxu0 }
 0x3f0   : > { %v2181_v19 = vadd.f32 %v2180_v34, %v4214_v41  ;;  %v2858_v23 = vpop.f32.mrb[57].mxu0 }
 0x3f1   : > { %v2492_v36 = vmax.f32 %v2482_v12, 0.0  ;;  %v2483_v13 = vadd.f32 %v4221_v16, %v2466_v37  ;;  %v2183_v25 = vpop.f32.mrb[58].mxu0 }
 0x3f2   : > { %v2184_v9 = vadd.f32 %v2183_v25, %v4216_v35  ;;  %v2859_v4 = vpop.f32.mrb[59].mxu0 }
 0x3f3   : > { %v2502_v46 = vsel %vm3770_vm8, %v2492_v36, 0.0  ;;  %v2493_v56 = vmax.f32 %v2483_v13, 0.0  ;;  %vm4450_vm8 = vmmov %vm4447_vm0 }
 0x3f4   : > { %2512 = vst.msk [vmem:[%s4228_s30 + $0x20] sm:$0xff] %vm4448_vm4, %v2502_v46  ;;  %v2446_v0 = vpop.f32.mrb[52].mxu1 }
 0x3f5   : > { %v2503_v39 = vsel %vm3795_vm7, %v2493_v56, 0.0  ;;  %v2467_v11 = vadd.f32 %v2446_v0, %v2173_v33  ;;  %v2878_v1 = vpop.f32.mrb[53].mxu1  ;;  %vm4451_vm7 = vmmov %vm4447_vm0 }
 0x3f6   : > { %2513 = vst.msk [vmem:[%s4228_s30 + $0x28] sm:$0xff] %vm4449_vm11, %v2503_v39  ;;  %v2449_v61 = vpop.f32.mrb[54].mxu1 }
 0x3f7   : > { %v2484_v5 = vadd.f32 %v4221_v16, %v2467_v11  ;;  %v2468_v6 = vadd.f32 %v2449_v61, %v2176_v20  ;;  %v2879_v22 = vpop.f32.mrb[55].mxu1 }
 0x3f9   : > { %v2494_v32 = vmax.f32 %v2484_v5, 0.0  ;;  %v2485_v27 = vadd.f32 %v4221_v16, %v2468_v6 }
 0x3fb   : > { %v2504_v45 = vsel %vm3844_vm10, %v2494_v32, 0.0  ;;  %v2495_v24 = vmax.f32 %v2485_v27, 0.0  ;;  %vm4452_vm10 = vnez %v4372_v62 }
 0x3fc   : > { %2514 = vst.msk [vmem:[%s4228_s30 + $0x30] sm:$0xff] %vm4450_vm8, %v2504_v45  ;;  %v2454_v41 = vpop.f32.mrb[56].mxu1 }
 0x3fd   : > { %v2505_v38 = vsel %vm3861_vm9, %v2495_v24, 0.0  ;;  %v2469_v50 = vadd.f32 %v2454_v41, %v2181_v19  ;;  %v2882_v17 = vpop.f32.mrb[57].mxu1  ;;  %vm4454_vm9 = vnez %v4374_v63 }
 0x3fe   : > { %2515 = vst.msk [vmem:[%s4228_s30 + $0x38] sm:$0xff] %vm4451_vm7, %v2505_v38  ;;  %v2457_v35 = vpop.f32.mrb[58].mxu1 }
 0x3ff   : > { %v2486_v18 = vadd.f32 %v4221_v16, %v2469_v50  ;;  %v2470_v15 = vadd.f32 %v2457_v35, %v2184_v9  ;;  %v2883_v31 = vpop.f32.mrb[59].mxu1 }
 0x401   : > { %v2496_v8 = vmax.f32 %v2486_v18, 0.0  ;;  %v2487_v43 = vadd.f32 %v4221_v16, %v2470_v15 }
 0x403   : > { %v2506_v58 = vsel %vm4452_vm10, %v2496_v8, 0.0  ;;  %v2497_v57 = vmax.f32 %v2487_v43, 0.0 }
 0x404   : > { %2516 = vst.msk [vmem:[%s4228_s30 + $0x40] sm:$0xff] %vm4453_vm1, %v2506_v58 }
 0x405   : > { %v2507_v28 = vsel %vm4454_vm9, %v2497_v57, 0.0 }
 0x406   : > { %2517 = vst.msk [vmem:[%s4228_s30 + $0x48] sm:$0xff] %vm4455_vm6, %v2507_v28 }
 0x407 PF: > { %s15_s18 = sadd.s32 1, %s2996_s18  }
 0x408   : > { %p12_p4 = scmp.ge.s32.totalorder %s15_s18, 4  }
 0x40a   :  { %14 = sbr.rel (!%p12_p4) target bundleno = 1 (0x1), region = 70 }

</bundles_post_ra>
